<compile_context>
chip_gen: v6e
topology: v6e:2x2x1
jax: 0.10.0
libtpu: 0.0.40
codegen_flags: <defaults>
</compile_context>

<pallas_src>
import jax
import jax.numpy as jnp
from jax.experimental import pallas as pl
from jax.experimental.pallas import tpu as pltpu

C1 = 0.01 ** 2
C2 = 0.03 ** 2


def _ssim_kernel(x_ref, y_ref, o_ref):
    # x_ref / y_ref / o_ref: (P, H, W) blocks of un-padded planes (NCHW native:
    # P planes leading, H on sublanes, W on lanes).
    P, H, W = o_ref.shape

    def refl_pad(a):
        # nn.ReflectionPad2d(1) fused into the kernel: pad rows (sublane axis)
        # then columns (lane axis) with the reflected edge slices.  No padded
        # copies of x / y ever touch HBM.
        a = jnp.concatenate([a[:, 1:2, :], a, a[:, H - 2:H - 1, :]], axis=1)
        a = jnp.concatenate([a[:, :, 1:2], a, a[:, :, W - 2:W - 1]], axis=2)
        return a  # (P, H + 2, W + 2)

    xp = refl_pad(x_ref[...])
    yp = refl_pad(y_ref[...])

    # Fused, separable 3x3 box sums of the five streams x, y, x^2, y^2, x*y.
    # Horizontal 3-tap pass (along W / lanes): each shifted window of x and y
    # is sliced once and feeds all five accumulators.
    hx = hy = hxx = hyy = hxy = None
    for dj in range(3):
        xs = xp[:, :, dj:dj + W]
        ys = yp[:, :, dj:dj + W]
        if dj == 0:
            hx, hy = xs, ys
            hxx, hyy, hxy = xs * xs, ys * ys, xs * ys
        else:
            hx = hx + xs
            hy = hy + ys
            hxx = hxx + xs * xs
            hyy = hyy + ys * ys
            hxy = hxy + xs * ys

    # Vertical 3-tap pass (along H / sublanes): (P, H+2, W) -> (P, H, W).
    def vsum(a):
        return a[:, 0:H, :] + a[:, 1:H + 1, :] + a[:, 2:H + 2, :]

    # Raw (un-normalized) 3x3 window sums.
    sx = vsum(hx)
    sy = vsum(hy)
    sxx = vsum(hxx)
    syy = vsum(hyy)
    sxy = vsum(hxy)

    # SSIM with the 1/9 pooling normalization folded into the constants:
    #   mu = S/9, so n and d are both scaled by 81**2 and the ratio is
    #   unchanged with C1 -> 81*C1, C2 -> 81*C2.  Saves five full-block
    #   multiplies per grid step (VALU-bound on v6e/v7x).
    a1 = 81.0 * C1
    a2 = 81.0 * C2
    sxsy = sx * sy
    sx2 = sx * sx
    sy2 = sy * sy
    n = (2.0 * sxsy + a1) * (18.0 * sxy - 2.0 * sxsy + a2)
    d = (sx2 + sy2 + a1) * (9.0 * (sxx + syy) - sx2 - sy2 + a2)

    # EUP reciprocal instead of a VALU divide.  approx=True was evaluated per
    # the review but the exact form is kept to stay inside the 2e-5 budget.
    loss = (1.0 - n * pl.reciprocal(d, approx=False)) * 0.5
    o_ref[...] = jnp.clip(loss, 0.0, 1.0)


def _vmem_limit_bytes():
    """Generation-aware VMEM budget (v5e/v6e: 128 MiB physical, v7x: 64 MiB)."""
    try:
        cap = int(pltpu.get_tpu_info().vmem_capacity_bytes)
    except Exception:  # off-TPU tracing / older API: conservative default
        cap = 64 * 1024 * 1024
    return min((cap * 3) // 4, 96 * 1024 * 1024)


def _choose_planes_per_block(num_planes, h, w, vmem_limit_bytes):
    """Planes processed per grid step.

    * keeps the live block-sized f32 temporaries plus pipeline buffers inside
      the generation-aware VMEM budget,
    * keeps at least two grid steps when possible so both TensorCores of a
      v7x chip get work,
    * always returns a divisor of num_planes (no partial blocks).
    """
    plane_bytes = (h + 2) * (w + 2) * 4   # padded f32 plane
    live_blocks = 30                      # conservative live-temporary count
    budget = max(vmem_limit_bytes // 2, plane_bytes)  # headroom for dbl-buffers
    max_p = max(1, budget // (live_blocks * plane_bytes))
    cap = num_planes if num_planes < 2 else num_planes // 2  # >= 2 grid steps
    best = 1
    for d in range(1, num_planes + 1):
        if num_planes % d == 0 and d <= max_p and d <= cap:
            best = d
    # TODO(synk): add an H row-tile (halo DMA) grid axis for images whose
    # single-plane working set exceeds the VMEM budget (e.g. >= 2k x 2k).
    return best


def ssim(x, y):
    """SSIM loss. x, y: float arrays of shape (B, C, H, W). Returns (B,C,H,W)."""
    assert x.shape == y.shape and x.ndim == 4
    B, C, H, W = x.shape
    assert H >= 2 and W >= 2, "ReflectionPad2d(1) needs spatial dims >= 2"
    N = B * C

    # Glue is reshape-only (free): no transposes, no padded HBM copies.
    x32 = x.astype(jnp.float32).reshape(N, H, W)
    y32 = y.astype(jnp.float32).reshape(N, H, W)

    vmem_limit = _vmem_limit_bytes()
    P = _choose_planes_per_block(N, H, W, vmem_limit)
    grid = (N // P,)

    cost = pl.CostEstimate(
        flops=50 * N * H * W,
        transcendentals=N * H * W,          # one reciprocal per output element
        bytes_accessed=3 * N * H * W * 4,   # read x, read y, write loss
    )

    out = pl.pallas_call(
        _ssim_kernel,
        out_shape=jax.ShapeDtypeStruct((N, H, W), jnp.float32),
        grid=grid,
        in_specs=[
            pl.BlockSpec((P, H, W), lambda i: (i, 0, 0)),
            pl.BlockSpec((P, H, W), lambda i: (i, 0, 0)),
        ],
        out_specs=pl.BlockSpec((P, H, W), lambda i: (i, 0, 0)),
        compiler_params=pltpu.CompilerParams(
            dimension_semantics=("parallel",),
            vmem_limit_bytes=vmem_limit,
        ),
        cost_estimate=cost,
    )(x32, y32)

    return out.reshape(B, C, H, W)


def _ssim_reference(x, y):
    # Pure-JAX reference mirroring the PyTorch module, for validation.
    pad = ((0, 0), (0, 0), (1, 1), (1, 1))
    xp = jnp.pad(x, pad, mode="reflect")
    yp = jnp.pad(y, pad, mode="reflect")

    def pool(img):
        return jax.lax.reduce_window(
            img, 0.0, jax.lax.add, (1, 1, 3, 3), (1, 1, 1, 1), "VALID"
        ) / 9.0

    mu_x = pool(xp)
    mu_y = pool(yp)
    sigma_x = pool(xp * xp) - mu_x ** 2
    sigma_y = pool(yp * yp) - mu_y ** 2
    sigma_xy = pool(xp * yp) - mu_x * mu_y
    n = (2 * mu_x * mu_y + C1) * (2 * sigma_xy + C2)
    d = (mu_x ** 2 + mu_y ** 2 + C1) * (sigma_x + sigma_y + C2)
    return jnp.clip((1 - n / d) / 2, 0.0, 1.0)


if __name__ == "__main__":
    key = jax.random.PRNGKey(0)
    kx, ky = jax.random.split(key)
    B, C, H, W = 2, 4, 16, 16
    x = jax.random.uniform(kx, (B, C, H, W), dtype=jnp.float32)
    y = jax.random.uniform(ky, (B, C, H, W), dtype=jnp.float32)

    out = jax.block_until_ready(ssim(x, y))
    ref = jax.block_until_ready(_ssim_reference(x, y))

    assert out.shape == (B, C, H, W)
    err = float(jnp.max(jnp.abs(out - ref)))
    assert err < 2e-5, f"max abs error {err}"

    print("KERNEL_OK")
</pallas_src>

<mosaic_0001>
module attributes {stable_mosaic.version = 11 : i64} {
  func.func @_ssim_kernel(%arg0: i32, %arg1: memref<4x16x16xf32, #tpu.memory_space<vmem>>, %arg2: memref<4x16x16xf32, #tpu.memory_space<vmem>>, %arg3: memref<4x16x16xf32, #tpu.memory_space<vmem>>) attributes {dimension_semantics = [#tpu.dimension_semantics<parallel>], iteration_bounds = array<i64: 2>, scalar_prefetch = 0 : i64, scratch_operands = 0 : i64, tpu.core_type = #tpu.core_type<tc>, window_params = [{transform_indices = @transform_0, window_bounds = array<i64: 4, 16, 16>}, {transform_indices = @transform_1, window_bounds = array<i64: 4, 16, 16>}, {transform_indices = @transform_2, window_bounds = array<i64: 4, 16, 16>}]} {
    %c0 = arith.constant 0 : index
    %c0_0 = arith.constant 0 : index
    %c0_1 = arith.constant 0 : index
    %0 = vector.load %arg1[%c0, %c0_0, %c0_1] : memref<4x16x16xf32, #tpu.memory_space<vmem>>, vector<4x16x16xf32>
    %1 = vector.extract_strided_slice %0 {offsets = [0, 1, 0], sizes = [4, 1, 16], strides = [1, 1, 1]} : vector<4x16x16xf32> to vector<4x1x16xf32>
    %2 = vector.extract_strided_slice %0 {offsets = [0, 14, 0], sizes = [4, 1, 16], strides = [1, 1, 1]} : vector<4x16x16xf32> to vector<4x1x16xf32>
    %3 = tpu.concatenate %1, %0, %2 in 1 : vector<4x1x16xf32>, vector<4x16x16xf32>, vector<4x1x16xf32> -> vector<4x18x16xf32>
    %4 = vector.extract_strided_slice %3 {offsets = [0, 0, 1], sizes = [4, 18, 1], strides = [1, 1, 1]} : vector<4x18x16xf32> to vector<4x18x1xf32>
    %5 = vector.extract_strided_slice %3 {offsets = [0, 0, 14], sizes = [4, 18, 1], strides = [1, 1, 1]} : vector<4x18x16xf32> to vector<4x18x1xf32>
    %6 = tpu.concatenate %4, %3, %5 in 2 : vector<4x18x1xf32>, vector<4x18x16xf32>, vector<4x18x1xf32> -> vector<4x18x18xf32>
    %c0_2 = arith.constant 0 : index
    %c0_3 = arith.constant 0 : index
    %c0_4 = arith.constant 0 : index
    %7 = vector.load %arg2[%c0_2, %c0_3, %c0_4] : memref<4x16x16xf32, #tpu.memory_space<vmem>>, vector<4x16x16xf32>
    %8 = vector.extract_strided_slice %7 {offsets = [0, 1, 0], sizes = [4, 1, 16], strides = [1, 1, 1]} : vector<4x16x16xf32> to vector<4x1x16xf32>
    %9 = vector.extract_strided_slice %7 {offsets = [0, 14, 0], sizes = [4, 1, 16], strides = [1, 1, 1]} : vector<4x16x16xf32> to vector<4x1x16xf32>
    %10 = tpu.concatenate %8, %7, %9 in 1 : vector<4x1x16xf32>, vector<4x16x16xf32>, vector<4x1x16xf32> -> vector<4x18x16xf32>
    %11 = vector.extract_strided_slice %10 {offsets = [0, 0, 1], sizes = [4, 18, 1], strides = [1, 1, 1]} : vector<4x18x16xf32> to vector<4x18x1xf32>
    %12 = vector.extract_strided_slice %10 {offsets = [0, 0, 14], sizes = [4, 18, 1], strides = [1, 1, 1]} : vector<4x18x16xf32> to vector<4x18x1xf32>
    %13 = tpu.concatenate %11, %10, %12 in 2 : vector<4x18x1xf32>, vector<4x18x16xf32>, vector<4x18x1xf32> -> vector<4x18x18xf32>
    %14 = vector.extract_strided_slice %6 {offsets = [0, 0, 0], sizes = [4, 18, 16], strides = [1, 1, 1]} : vector<4x18x18xf32> to vector<4x18x16xf32>
    %15 = vector.extract_strided_slice %13 {offsets = [0, 0, 0], sizes = [4, 18, 16], strides = [1, 1, 1]} : vector<4x18x18xf32> to vector<4x18x16xf32>
    %16 = arith.mulf %14, %14 : vector<4x18x16xf32>
    %17 = arith.mulf %15, %15 : vector<4x18x16xf32>
    %18 = arith.mulf %14, %15 : vector<4x18x16xf32>
    %19 = vector.extract_strided_slice %6 {offsets = [0, 0, 1], sizes = [4, 18, 16], strides = [1, 1, 1]} : vector<4x18x18xf32> to vector<4x18x16xf32>
    %20 = vector.extract_strided_slice %13 {offsets = [0, 0, 1], sizes = [4, 18, 16], strides = [1, 1, 1]} : vector<4x18x18xf32> to vector<4x18x16xf32>
    %21 = arith.addf %14, %19 : vector<4x18x16xf32>
    %22 = arith.addf %15, %20 : vector<4x18x16xf32>
    %23 = arith.mulf %19, %19 : vector<4x18x16xf32>
    %24 = arith.addf %16, %23 : vector<4x18x16xf32>
    %25 = arith.mulf %20, %20 : vector<4x18x16xf32>
    %26 = arith.addf %17, %25 : vector<4x18x16xf32>
    %27 = arith.mulf %19, %20 : vector<4x18x16xf32>
    %28 = arith.addf %18, %27 : vector<4x18x16xf32>
    %29 = vector.extract_strided_slice %6 {offsets = [0, 0, 2], sizes = [4, 18, 16], strides = [1, 1, 1]} : vector<4x18x18xf32> to vector<4x18x16xf32>
    %30 = vector.extract_strided_slice %13 {offsets = [0, 0, 2], sizes = [4, 18, 16], strides = [1, 1, 1]} : vector<4x18x18xf32> to vector<4x18x16xf32>
    %31 = arith.addf %21, %29 : vector<4x18x16xf32>
    %32 = arith.addf %22, %30 : vector<4x18x16xf32>
    %33 = arith.mulf %29, %29 : vector<4x18x16xf32>
    %34 = arith.addf %24, %33 : vector<4x18x16xf32>
    %35 = arith.mulf %30, %30 : vector<4x18x16xf32>
    %36 = arith.addf %26, %35 : vector<4x18x16xf32>
    %37 = arith.mulf %29, %30 : vector<4x18x16xf32>
    %38 = arith.addf %28, %37 : vector<4x18x16xf32>
    %39 = vector.extract_strided_slice %31 {offsets = [0, 0, 0], sizes = [4, 16, 16], strides = [1, 1, 1]} : vector<4x18x16xf32> to vector<4x16x16xf32>
    %40 = vector.extract_strided_slice %31 {offsets = [0, 1, 0], sizes = [4, 16, 16], strides = [1, 1, 1]} : vector<4x18x16xf32> to vector<4x16x16xf32>
    %41 = arith.addf %39, %40 : vector<4x16x16xf32>
    %42 = vector.extract_strided_slice %31 {offsets = [0, 2, 0], sizes = [4, 16, 16], strides = [1, 1, 1]} : vector<4x18x16xf32> to vector<4x16x16xf32>
    %43 = arith.addf %41, %42 : vector<4x16x16xf32>
    %44 = vector.extract_strided_slice %32 {offsets = [0, 0, 0], sizes = [4, 16, 16], strides = [1, 1, 1]} : vector<4x18x16xf32> to vector<4x16x16xf32>
    %45 = vector.extract_strided_slice %32 {offsets = [0, 1, 0], sizes = [4, 16, 16], strides = [1, 1, 1]} : vector<4x18x16xf32> to vector<4x16x16xf32>
    %46 = arith.addf %44, %45 : vector<4x16x16xf32>
    %47 = vector.extract_strided_slice %32 {offsets = [0, 2, 0], sizes = [4, 16, 16], strides = [1, 1, 1]} : vector<4x18x16xf32> to vector<4x16x16xf32>
    %48 = arith.addf %46, %47 : vector<4x16x16xf32>
    %49 = vector.extract_strided_slice %34 {offsets = [0, 0, 0], sizes = [4, 16, 16], strides = [1, 1, 1]} : vector<4x18x16xf32> to vector<4x16x16xf32>
    %50 = vector.extract_strided_slice %34 {offsets = [0, 1, 0], sizes = [4, 16, 16], strides = [1, 1, 1]} : vector<4x18x16xf32> to vector<4x16x16xf32>
    %51 = arith.addf %49, %50 : vector<4x16x16xf32>
    %52 = vector.extract_strided_slice %34 {offsets = [0, 2, 0], sizes = [4, 16, 16], strides = [1, 1, 1]} : vector<4x18x16xf32> to vector<4x16x16xf32>
    %53 = arith.addf %51, %52 : vector<4x16x16xf32>
    %54 = vector.extract_strided_slice %36 {offsets = [0, 0, 0], sizes = [4, 16, 16], strides = [1, 1, 1]} : vector<4x18x16xf32> to vector<4x16x16xf32>
    %55 = vector.extract_strided_slice %36 {offsets = [0, 1, 0], sizes = [4, 16, 16], strides = [1, 1, 1]} : vector<4x18x16xf32> to vector<4x16x16xf32>
    %56 = arith.addf %54, %55 : vector<4x16x16xf32>
    %57 = vector.extract_strided_slice %36 {offsets = [0, 2, 0], sizes = [4, 16, 16], strides = [1, 1, 1]} : vector<4x18x16xf32> to vector<4x16x16xf32>
    %58 = arith.addf %56, %57 : vector<4x16x16xf32>
    %59 = vector.extract_strided_slice %38 {offsets = [0, 0, 0], sizes = [4, 16, 16], strides = [1, 1, 1]} : vector<4x18x16xf32> to vector<4x16x16xf32>
    %60 = vector.extract_strided_slice %38 {offsets = [0, 1, 0], sizes = [4, 16, 16], strides = [1, 1, 1]} : vector<4x18x16xf32> to vector<4x16x16xf32>
    %61 = arith.addf %59, %60 : vector<4x16x16xf32>
    %62 = vector.extract_strided_slice %38 {offsets = [0, 2, 0], sizes = [4, 16, 16], strides = [1, 1, 1]} : vector<4x18x16xf32> to vector<4x16x16xf32>
    %63 = arith.addf %61, %62 : vector<4x16x16xf32>
    %64 = arith.mulf %43, %48 : vector<4x16x16xf32>
    %65 = arith.mulf %43, %43 : vector<4x16x16xf32>
    %66 = arith.mulf %48, %48 : vector<4x16x16xf32>
    %cst = arith.constant 2.000000e+00 : f32
    %67 = vector.broadcast %cst : f32 to vector<4x16x16xf32>
    %68 = arith.mulf %67, %64 : vector<4x16x16xf32>
    %cst_5 = arith.constant 8.100000e-03 : f32
    %69 = vector.broadcast %cst_5 : f32 to vector<4x16x16xf32>
    %70 = arith.addf %68, %69 : vector<4x16x16xf32>
    %cst_6 = arith.constant 1.800000e+01 : f32
    %71 = vector.broadcast %cst_6 : f32 to vector<4x16x16xf32>
    %72 = arith.mulf %71, %63 : vector<4x16x16xf32>
    %cst_7 = arith.constant 2.000000e+00 : f32
    %73 = vector.broadcast %cst_7 : f32 to vector<4x16x16xf32>
    %74 = arith.mulf %73, %64 : vector<4x16x16xf32>
    %75 = arith.subf %72, %74 : vector<4x16x16xf32>
    %cst_8 = arith.constant 7.290000e-02 : f32
    %76 = vector.broadcast %cst_8 : f32 to vector<4x16x16xf32>
    %77 = arith.addf %75, %76 : vector<4x16x16xf32>
    %78 = arith.mulf %70, %77 : vector<4x16x16xf32>
    %79 = arith.addf %65, %66 : vector<4x16x16xf32>
    %cst_9 = arith.constant 8.100000e-03 : f32
    %80 = vector.broadcast %cst_9 : f32 to vector<4x16x16xf32>
    %81 = arith.addf %79, %80 : vector<4x16x16xf32>
    %82 = arith.addf %53, %58 : vector<4x16x16xf32>
    %cst_10 = arith.constant 9.000000e+00 : f32
    %83 = vector.broadcast %cst_10 : f32 to vector<4x16x16xf32>
    %84 = arith.mulf %83, %82 : vector<4x16x16xf32>
    %85 = arith.subf %84, %65 : vector<4x16x16xf32>
    %86 = arith.subf %85, %66 : vector<4x16x16xf32>
    %cst_11 = arith.constant 7.290000e-02 : f32
    %87 = vector.broadcast %cst_11 : f32 to vector<4x16x16xf32>
    %88 = arith.addf %86, %87 : vector<4x16x16xf32>
    %89 = arith.mulf %81, %88 : vector<4x16x16xf32>
    %90 = tpu.reciprocal %89 : vector<4x16x16xf32> -> vector<4x16x16xf32>
    %91 = arith.mulf %78, %90 : vector<4x16x16xf32>
    %cst_12 = arith.constant 1.000000e+00 : f32
    %92 = vector.broadcast %cst_12 : f32 to vector<4x16x16xf32>
    %93 = arith.subf %92, %91 : vector<4x16x16xf32>
    %cst_13 = arith.constant 5.000000e-01 : f32
    %94 = vector.broadcast %cst_13 : f32 to vector<4x16x16xf32>
    %95 = arith.mulf %93, %94 : vector<4x16x16xf32>
    %cst_14 = arith.constant 0.000000e+00 : f32
    %cst_15 = arith.constant 1.000000e+00 : f32
    %96 = vector.broadcast %cst_14 : f32 to vector<4x16x16xf32>
    %97 = arith.maximumf %96, %95 : vector<4x16x16xf32>
    %98 = vector.broadcast %cst_15 : f32 to vector<4x16x16xf32>
    %99 = arith.minimumf %98, %97 : vector<4x16x16xf32>
    %c0_16 = arith.constant 0 : index
    %c0_17 = arith.constant 0 : index
    %c0_18 = arith.constant 0 : index
    %100 = vector.load %arg3[%c0_16, %c0_17, %c0_18] : memref<4x16x16xf32, #tpu.memory_space<vmem>>, vector<4x16x16xf32>
    tpu.vector_store %arg3[%c0_16, %c0_17, %c0_18], %99 {strides = array<i32>} : memref<4x16x16xf32, #tpu.memory_space<vmem>>, vector<4x16x16xf32>,
    return
  }
  func.func @transform_0(%arg0: i32) -> (i32, i32, i32) {
    %c0_i32 = arith.constant 0 : i32
    %c0_i32_0 = arith.constant 0 : i32
    %c0_i32_1 = arith.constant 0 : i32
    return %arg0, %c0_i32, %c0_i32_0 : i32, i32, i32
  }
  func.func @transform_1(%arg0: i32) -> (i32, i32, i32) {
    %c0_i32 = arith.constant 0 : i32
    %c0_i32_0 = arith.constant 0 : i32
    %c0_i32_1 = arith.constant 0 : i32
    return %arg0, %c0_i32, %c0_i32_0 : i32, i32, i32
  }
  func.func @transform_2(%arg0: i32) -> (i32, i32, i32) {
    %c0_i32 = arith.constant 0 : i32
    %c0_i32_0 = arith.constant 0 : i32
    %c0_i32_1 = arith.constant 0 : i32
    return %arg0, %c0_i32, %c0_i32_0 : i32, i32, i32
  }
}

</mosaic_0001>

<bundles_post_ra>
// kernel: tpu_custom_call.1
= control target key start
LH: loop header
LB: loop body
LE: loop exit
PB: predicated region body
PF: predicated region fallthrough
CT: control target
= control target key end

     0   :  { %7 = vsyncpa [#allocation3], 0  ;;  %s3638_s0 = inlined_call_operand.hbm [shape: f32[8,16,16], index: 0, kind: input, shape index: {}]   ;;  %s3639_s1 = inlined_call_operand.hbm [shape: f32[8,16,16], index: 1, kind: input, shape index: {}]   ;;  %s3640_s2 = inlined_call_operand.hbm [shape: f32[8,16,16], index: 2, kind: output, shape index: {}]  }
   0x1   :  { %9 = vsyncpa [#allocation3 + $0x1], 0 }
   0x2   :  { %10 = vsyncpa [#allocation6], 0 }
   0x3   :  { %12 = vsyncpa [#allocation6 + $0x1], 0 }
   0x4   :  { %13 = vsyncpa [#allocation4], 0 }
   0x5   :  { %15 = vsyncpa [#allocation4 + $0x1], 0  ;;  %s2166_s9 = smov 0   ;;  %s2168_s10 = smov 0  }
   0x6   :  { %s2170_s11 = smov 0   ;;  %s2172_s12 = smov 0  }
   0x7 LB: > { %s2187_s13 = sadd.s32 4294967295, %s2138_s12   ;;  %s1912_s14 = sadd.s32 4294967294, %s2138_s12   ;;  %s2138_s12 = sphi %s2172_s12, %s3860_s12   ;;  %s2134_s11 = sphi %s2170_s11, %s3859_s11   ;;  %s2130_s10 = sphi %s2168_s10, %s3858_s10   ;;  %s2126_s9 = sphi %s2166_s9, %s3857_s9  }
   0x8   : > { %s2191_s15 = sadd.s32 1, %s2138_s12   ;;  %s28_s16 = sadd.s32 1, %s2134_s11 }
   0x9   : > { %s25_s17 = ssub.s32 %s2138_s12, %s2191_s15  ;;  %p35_p0 = scmp.ne.s32.totalorder %s2134_s11, %s2130_s10 }
   0xa   : > { %p26_p1 = scmp.eq.s32.totalorder %s25_s17, 0  ;;  %p36_p2 = scmp.eq.s32.totalorder %s2138_s12, 0 }
   0xb   : > { %p41_p3 = scmp.ne.s32.totalorder %s2130_s10, %s2126_s9  ;;  %p42_p4 = scmp.eq.s32.totalorder %s2187_s13, 0 }
   0xc   : > { %s2203_s18 = scalar_select %p26_p1, %s2134_s11, %s28_s16  }
   0xd   : > { %p2205_p5 = por %p36_p2, %p35_p0  ;;  %p2209_p6 = por %p42_p4, %p41_p3 }
   0xe   : > { %p91_p7 = scmp.eq.s32.totalorder %s2187_s13, 1  ;;  %p97_p8 = scmp.eq.s32.totalorder %s1912_s14, 1 }
   0xf   : > { %s3674_s20 = scalar_select %p2209_p6, 1, 0 }
  0x10   : > { %p1956_p10 = scmp.lt.s32.totalorder %s2138_s12, 2  ;;  %p2216_p11 = por %p91_p7, %p35_p0 }
  0x11   : > { %p2220_p12 = por %p97_p8, %p41_p3  ;;  %s2225_s23 = sand.u32 1, %s2134_s11  }
  0x12   : > { %s3675_s21 = scalar_select %p2216_p11, 1, 0 }
  0x13   : > { %s3676_s22 = scalar_select %p2220_p12, 1, 0 }
  0x14   : > { %s1934_s24 = sshll.u32 %s2138_s12, 10  ;;  %s1915_s25 = sshll.u32 %s2225_s23, 6 }
  0x15   : > { %s2234_s28 = scalar_lea.hbm %s3638_s0, %s1934_s24  ;;  %s121_s29 = scalar_lea.vmem [#allocation2], %s1915_s25 }
  0x16   : > { %s129_s30 = sshll.u32 %s121_s29, 4  ;;  %p2240_p13 = pnand %p1956_p10, %p2205_p5  ;;  %s2244_s30 = int_to_ptr.vmem [resolvable:$true] %s129_s30 }
  0x17   : > { %s118_s4 = scalar_lea.sflag [#allocation3], %s2225_s23  ;;  %s2014_s5 = scalar_lea.hbm %s2234_s28, 1024 }
  0x18   : > { %p2015_p0 = scmp.ne.s32.totalorder %s2234_s28, %s2014_s5  ;;  %p2016_p1 = pneg %p2240_p13 }
  0x19   : > { %s2019_s8 = scalar_lea.hbm %s3638_s0, 2048  ;;  %p2020_p4 = scmp.lt.s32.totalorder %s2234_s28, %s3638_s0 }
  0x1a   : > { %p2017_p2 = pnand %p2016_p1, %p2015_p0  ;;  %p2021_p5 = scmp.lt.s32.totalorder %s2019_s8, %s2014_s5 }
  0x1c   : > { %p2018_p3 = pneg %p2017_p2  ;;  %p2022_p7 = por %p2021_p5, %p2020_p4 }
  0x1e   : > { %p2023_p8 = pnand %p2022_p7, %p2018_p3 }
  0x20   : > { %2026 = shalt.err (!%p2023_p8)
}
  0x21   : > { %s2027_s17 = scalar_lea.vmem %s2244_s30, 1024  ;;  %s2140_s19 = smov [#allocation2]  }
  0x22   : > { %p2028_p10 = scmp.ne.s32.totalorder %s2244_s30, %s2027_s17  ;;  %s2032_s26 = sshll.u32 %s2140_s19, 4  ;;  %s2033_s26 = int_to_ptr.vmem [resolvable:$false] %s2032_s26 }
  0x23   : > { %s2034_s27 = scalar_lea.vmem %s2033_s26, 2048  ;;  %p2035_p9 = scmp.lt.s32.totalorder %s2244_s30, %s2033_s26 }
  0x24   : > { %p2030_p0 = pnand %p2028_p10, %p2016_p1  ;;  %p2036_p12 = scmp.lt.s32.totalorder %s2034_s27, %s2027_s17 }
  0x26   : > { %p2031_p2 = pneg %p2030_p0  ;;  %p2037_p11 = por %p2036_p12, %p2035_p9 }
  0x28   : > { %p2038_p4 = pnand %p2037_p11, %p2031_p2 }
  0x2a   : > { %2041 = shalt.err (!%p2038_p4)
}
  0x2b   : > { %s2141_s29 = smov 128   ;;  %s2142_s5 = smov 8  }
  0x2c   : > { %1948 = dma.hbm_to_vmem [thread:$0]  (!%p2240_p13), %s2234_s28, 1024, %s2244_s30, %s118_s4, %s2141_s29, %s2141_s29, %s2142_s5  }
  0x2d   : > { %p1923_p9 = scmp.ge.s32.totalorder %s2138_s12, 1  ;;  %p159_p11 = scmp.lt.s32.totalorder %s2138_s12, 3 }
  0x2e   : > { %s2287_s14 = scalar_lea.hbm %s3639_s1, %s1934_s24  ;;  %s143_s16 = scalar_lea.vmem [#allocation5], %s1915_s25 }
  0x2f   : > { %p2278_p12 = pnand %p1923_p9, %p159_p11  ;;  %s151_s17 = sshll.u32 %s143_s16, 4  ;;  %s2291_s17 = int_to_ptr.vmem [resolvable:$true] %s151_s17 }
  0x30   : > { %s140_s28 = scalar_lea.sflag [#allocation6], %s2225_s23  ;;  %s2042_s30 = scalar_lea.hbm %s2287_s14, 1024 }
  0x31   : > { %p2043_p3 = scmp.ne.s32.totalorder %s2287_s14, %s2042_s30  ;;  %s2047_s24 = scalar_lea.hbm %s3639_s1, 2048 }
  0x32   : > { %p2048_p8 = scmp.lt.s32.totalorder %s2287_s14, %s3639_s1  ;;  %p2049_p10 = scmp.lt.s32.totalorder %s2047_s24, %s2042_s30 }
  0x33   : > { %p2045_p5 = pnand %p2043_p3, %p2016_p1 }
  0x34   : > { %p2050_p0 = por %p2049_p10, %p2048_p8 }
  0x35   : > { %p2046_p7 = pneg %p2045_p5 }
  0x37   : > { %p2051_p2 = pnand %p2050_p0, %p2046_p7 }
  0x39   : > { %2054 = shalt.err (!%p2051_p2)
}
  0x3a   : > { %s2055_s23 = scalar_lea.vmem %s2291_s17, 1024  ;;  %s2143_s25 = smov [#allocation5]  }
  0x3b   : > { %p2056_p4 = scmp.ne.s32.totalorder %s2291_s17, %s2055_s23  ;;  %s2060_s7 = sshll.u32 %s2143_s25, 4  ;;  %s2061_s7 = int_to_ptr.vmem [resolvable:$false] %s2060_s7 }
  0x3c   : > { %s2062_s8 = scalar_lea.vmem %s2061_s7, 2048  ;;  %p2063_p3 = scmp.lt.s32.totalorder %s2291_s17, %s2061_s7 }
  0x3d   : > { %p2058_p9 = pnand %p2056_p4, %p2016_p1  ;;  %p2064_p5 = scmp.lt.s32.totalorder %s2062_s8, %s2055_s23 }
  0x3f   : > { %p2059_p11 = pneg %p2058_p9  ;;  %p2065_p6 = por %p2064_p5, %p2063_p3 }
  0x41   : > { %p2066_p8 = pnand %p2065_p6, %p2059_p11 }
  0x43   : > { %2069 = shalt.err (!%p2066_p8)
}
  0x44   : > { %1951 = dma.hbm_to_vmem [thread:$0]  (!%p2240_p13), %s2287_s14, 1024, %s2291_s17, %s140_s28, %s2141_s29, %s2141_s29, %s2142_s5  }
  0x45   : > { %163 = sbr.rel (%p2278_p12) target bundleno = 709 (0x2c5), region = 28 }
  0x4a   : > { %s2322_s16 = sand.u32 1, %s2130_s10   ;;  %p3679_p6 = scmp.ne.s32.totalorder %s3674_s20, 0 }
  0x4b   : > { %s2325_s30 = sshll.u32 %s2322_s16, 6  ;;  %s166_s4 = scalar_lea.sflag [#allocation3], %s2322_s16 }
  0x4c   : > { %s2329_s3 = scalar_lea.vmem [#allocation2], %s2325_s30 }
  0x4d   : > { %2113 = dma.done.wait (%p3679_p6), %s166_s4, 1024  }
  0x4e   : > { %2115 = vsyncadd (%p3679_p6), %s166_s4, 4294966272  ;;  %s175_s29 = scalar_lea.sflag [#allocation6], %s2322_s16  ;;  %s2337_s5 = scalar_lea.vmem [#allocation5], %s2325_s30 }
  0x4f   : > { %2117 = dma.done.wait (%p3679_p6), %s175_s29, 1024  }
  0x50   : > { %2119 = vsyncadd (%p3679_p6), %s175_s29, 4294966272  ;;  %v208_v0 = vld [vmem:[%s2329_s3 + $0x8] sm:$0xff]  ;;  %vm231_vm0 = vcmask 1040384   ;;  %v207_v1 = vld [vmem:[%s2329_s3] sm:$0xff]  ;;  %s2144_s20 = smov 127   ;;  %s2145_s6 = smov 1  }
  0x51   : > { %v209_v2 = vld [vmem:[%s2329_s3 + $0x10] sm:$0xff]  ;;  %v233_v3 = vrot.slane %v208_v0, 7  ;;  %v252_v4 = vrot.slane %v208_v0, 5  ;;  %v219_v5 = vrot.slane %v207_v1, 1  ;;  %v232_v6 = vrot.slane %v207_v1, 7  ;;  %v210_v9 = vld [vmem:[%s2329_s3 + $0x18] sm:$0xff] }
  0x52   : > { %v220_v7 = vrot.slane %v209_v2, 1  ;;  %v235_v8 = vrot.slane %v209_v2, 7  ;;  %v236_v14 = vrot.slane %v210_v9, 7  ;;  %v253_v15 = vrot.slane %v210_v9, 5  ;;  %v211_v16 = vld [vmem:[%s2329_s3 + $0x20] sm:$0xff]  ;;  %v212_v17 = vld [vmem:[%s2329_s3 + $0x28] sm:$0xff] }
  0x53   : > { %v264_v10 = vsel %vm231_vm0, %v233_v3, %v252_v4  ;;  %v260_v11 = vsel %vm231_vm0, %v219_v5, %v232_v6  ;;  %v234_v13 = vsel %vm231_vm0, %v232_v6, %v233_v3  ;;  %v238_v18 = vrot.slane %v211_v16, 7  ;;  %v213_v23 = vld [vmem:[%s2329_s3 + $0x30] sm:$0xff]  ;;  %v214_v29 = vld [vmem:[%s2329_s3 + $0x38] sm:$0xff]  ;;  %s2146_s14 = smov 3   ;;  %v410_v36 = vld [vmem:[%s2337_s5] sm:$0xff]  ;;  %s2147_s17 = smov 126  }
  0x54   : > { %280 = vrot.lane.b32.xlu1 %v264_v10, %s2144_s20  ;;  %276 = vrot.lane.b32.xlu0 %v260_v11, %s2144_s20  ;;  %v261_v12 = vsel %vm231_vm0, %v220_v7, %v235_v8  ;;  %v265_v19 = vsel %vm231_vm0, %v236_v14, %v253_v15  ;;  %v237_v20 = vsel %vm231_vm0, %v235_v8, %v236_v14  ;;  %v239_v21 = vrot.slane %v212_v17, 7  ;;  %v411_v37 = vld [vmem:[%s2337_s5 + $0x8] sm:$0xff]  ;;  %v412_v41 = vld [vmem:[%s2337_s5 + $0x10] sm:$0xff]  ;;  %s3559_s28 = scalar_lea.vmem [#allocation7], %s2325_s30  ;;  %s1938_s19 = sshll.u32 %s2187_s13, 10 }
  0x55   : > { %v221_v22 = vrot.slane %v211_v16, 1  ;;  %v222_v24 = vrot.slane %v213_v23, 1  ;;  %v241_v27 = vrot.slane %v213_v23, 7  ;;  %v254_v28 = vrot.slane %v212_v17, 5  ;;  %v413_v47 = vld [vmem:[%s2337_s5 + $0x18] sm:$0xff]  ;;  %v414_v52 = vld [vmem:[%s2337_s5 + $0x20] sm:$0xff]  ;;  %s3589_s23 = scalar_lea.hbm %s3640_s2, %s1938_s19 }
  0x56   : > { %v240_v25 = vsel %vm231_vm0, %v238_v18, %v239_v21  ;;  %v242_v32 = vrot.slane %v214_v29, 7  ;;  %v255_v33 = vrot.slane %v214_v29, 5  ;;  %v434_v38 = vrot.slane %v410_v36, 7  ;;  %v415_v53 = vld [vmem:[%s2337_s5 + $0x28] sm:$0xff]  ;;  %v416_v59 = vld [vmem:[%s2337_s5 + $0x30] sm:$0xff]  ;;  %v417_v1 = vld [vmem:[%s2337_s5 + $0x38] sm:$0xff] }
  0x57   : > { %v262_v26 = vsel %vm231_vm0, %v221_v22, %v238_v18  ;;  %v263_v30 = vsel %vm231_vm0, %v222_v24, %v241_v27  ;;  %v266_v31 = vsel %vm231_vm0, %v239_v21, %v254_v28  ;;  %v435_v39 = vrot.slane %v411_v37, 7  ;;  %s1816_s24 = sshll.u32 %s3559_s28, 4  ;;  %s1802_s13 = scalar_lea.sflag [#allocation4], %s2322_s16  ;;  %s3591_s24 = int_to_ptr.vmem [resolvable:$true] %s1816_s24 }
  0x58   : > { %282 = vrot.lane.b32.xlu1 %v261_v12, %s2144_s20  ;;  %278 = vrot.lane.b32.xlu0 %v234_v13, %s2144_s20  ;;  %v267_v34 = vsel %vm231_vm0, %v242_v32, %v255_v33  ;;  %v243_v35 = vsel %vm231_vm0, %v241_v27, %v242_v32  ;;  %v422_v40 = vrot.slane %v410_v36, 1  ;;  %v423_v42 = vrot.slane %v412_v41, 1  ;;  %s2070_s25 = scalar_lea.vmem %s3591_s24, 1024  ;;  %p3854_p1 = scmp.ne.s32.totalorder %s3675_s21, 0 }
  0x59   : > { %v436_v43 = vsel %vm231_vm0, %v434_v38, %v435_v39  ;;  %v437_v45 = vrot.slane %v412_v41, 7  ;;  %v454_v46 = vrot.slane %v411_v37, 5  ;;  %v438_v50 = vrot.slane %v413_v47, 7  ;;  %p2071_p13 = scmp.ne.s32.totalorder %s3591_s24, %s2070_s25  ;;  %s2148_s7 = smov [#allocation7]  }
  0x5a   : > { %v462_v44 = vsel %vm231_vm0, %v422_v40, %v434_v38  ;;  %v455_v51 = vrot.slane %v413_v47, 5  ;;  %v440_v54 = vrot.slane %v414_v52, 7  ;;  %v441_v55 = vrot.slane %v415_v53, 7  ;;  %s2074_s8 = sshll.u32 %s2148_s7, 4  ;;  %s2075_s8 = int_to_ptr.vmem [resolvable:$false] %s2074_s8 }
  0x5b   : > { %v463_v48 = vsel %vm231_vm0, %v423_v42, %v437_v45  ;;  %v466_v49 = vsel %vm231_vm0, %v435_v39, %v454_v46  ;;  %v439_v57 = vsel %vm231_vm0, %v437_v45, %v438_v50  ;;  %v424_v58 = vrot.slane %v414_v52, 1  ;;  %p2072_p12 = pnand %p2071_p13, %p3854_p1  ;;  %s2076_s30 = scalar_lea.vmem %s2075_s8, 2048 }
  0x5c   : > { %286 = vrot.lane.b32.xlu1 %v265_v19, %s2144_s20  ;;  %284 = vrot.lane.b32.xlu0 %v237_v20, %s2144_s20  ;;  %v467_v56 = vsel %vm231_vm0, %v438_v50, %v455_v51  ;;  %v442_v60 = vsel %vm231_vm0, %v440_v54, %v441_v55  ;;  %v425_v62 = vrot.slane %v416_v59, 1  ;;  %v443_v63 = vrot.slane %v416_v59, 7  ;;  %p2077_p10 = scmp.lt.s32.totalorder %s3591_s24, %s2075_s8  ;;  %p2078_p0 = scmp.lt.s32.totalorder %s2076_s30, %s2070_s25 }
  0x5d   : > { %v464_v61 = vsel %vm231_vm0, %v424_v58, %v440_v54  ;;  %v456_v0 = vrot.slane %v415_v53, 5  ;;  %v444_v4 = vrot.slane %v417_v1, 7  ;;  %v457_v5 = vrot.slane %v417_v1, 5  ;;  %p2073_p7 = pneg %p2072_p12 }
  0x5e   : > { %v465_v2 = vsel %vm231_vm0, %v425_v62, %v443_v63  ;;  %vm384_vm1 = vcmask 7168   ;;  %vm397_vm2 = vcmask 138240   ;;  %vm1198_vm3 = vcmask 1046528   ;;  %p2079_p2 = por %p2078_p0, %p2077_p10 }
  0x5f   : > { %v468_v3 = vsel %vm231_vm0, %v441_v55, %v456_v0  ;;  %v469_v6 = vsel %vm231_vm0, %v444_v4, %v457_v5  ;;  %v445_v7 = vsel %vm231_vm0, %v443_v63, %v444_v4  ;;  %vm1235_vm4 = vcmask 1045504  }
  0x60   : > { %290 = vrot.lane.b32.xlu1 %v240_v25, %s2144_s20  ;;  %288 = vrot.lane.b32.xlu0 %v262_v26, %s2144_s20  ;;  %vm1792_vm5 = vcmask 130048   ;;  %p2080_p4 = pnand %p2079_p2, %p2073_p7 }
  0x64   : > { %294 = vrot.lane.b32.xlu1 %v263_v30, %s2144_s20  ;;  %292 = vrot.lane.b32.xlu0 %v266_v31, %s2144_s20 }
  0x68   : > { %298 = vrot.lane.b32.xlu1 %v267_v34, %s2144_s20  ;;  %296 = vrot.lane.b32.xlu0 %v243_v35, %s2144_s20 }
  0x6c   : > { %314 = vrot.lane.b32.xlu1 %v234_v13, %s2145_s6  ;;  %312 = vrot.lane.b32.xlu0 %v260_v11, %s2145_s6 }
  0x70   : > { %318 = vrot.lane.b32.xlu1 %v261_v12, %s2145_s6  ;;  %316 = vrot.lane.b32.xlu0 %v264_v10, %s2145_s6 }
  0x74   : > { %322 = vrot.lane.b32.xlu1 %v265_v19, %s2145_s6  ;;  %320 = vrot.lane.b32.xlu0 %v237_v20, %s2145_s6 }
  0x78   : > { %326 = vrot.lane.b32.xlu1 %v240_v25, %s2145_s6  ;;  %324 = vrot.lane.b32.xlu0 %v262_v26, %s2145_s6 }
  0x7c   : > { %330 = vrot.lane.b32.xlu1 %v263_v30, %s2145_s6  ;;  %328 = vrot.lane.b32.xlu0 %v266_v31, %s2145_s6 }
  0x80   : > { %334 = vrot.lane.b32.xlu1 %v267_v34, %s2145_s6  ;;  %332 = vrot.lane.b32.xlu0 %v243_v35, %s2145_s6 }
  0x84   : > { %350 = vrot.lane.b32.xlu1 %v234_v13, %s2146_s14  ;;  %348 = vrot.lane.b32.xlu0 %v260_v11, %s2146_s14 }
  0x88   : > { %354 = vrot.lane.b32.xlu1 %v261_v12, %s2146_s14  ;;  %352 = vrot.lane.b32.xlu0 %v264_v10, %s2146_s14 }
  0x8c   : > { %358 = vrot.lane.b32.xlu1 %v265_v19, %s2146_s14  ;;  %356 = vrot.lane.b32.xlu0 %v237_v20, %s2146_s14 }
  0x90   : > { %362 = vrot.lane.b32.xlu1 %v240_v25, %s2146_s14  ;;  %360 = vrot.lane.b32.xlu0 %v262_v26, %s2146_s14 }
  0x94   : > { %366 = vrot.lane.b32.xlu1 %v263_v30, %s2146_s14  ;;  %364 = vrot.lane.b32.xlu0 %v266_v31, %s2146_s14 }
  0x98   : > { %370 = vrot.lane.b32.xlu1 %v267_v34, %s2146_s14  ;;  %368 = vrot.lane.b32.xlu0 %v243_v35, %s2146_s14 }
  0x9c   : > { %480 = vrot.lane.b32.xlu1 %v436_v43, %s2144_s20  ;;  %478 = vrot.lane.b32.xlu0 %v462_v44, %s2144_s20 }
  0xa0   : > { %484 = vrot.lane.b32.xlu1 %v463_v48, %s2144_s20  ;;  %482 = vrot.lane.b32.xlu0 %v466_v49, %s2144_s20 }
  0xa4   : > { %488 = vrot.lane.b32.xlu1 %v467_v56, %s2144_s20  ;;  %486 = vrot.lane.b32.xlu0 %v439_v57, %s2144_s20 }
  0xa8   : > { %492 = vrot.lane.b32.xlu1 %v442_v60, %s2144_s20  ;;  %490 = vrot.lane.b32.xlu0 %v464_v61, %s2144_s20 }
  0xac   : > { %496 = vrot.lane.b32.xlu1 %v465_v2, %s2144_s20  ;;  %494 = vrot.lane.b32.xlu0 %v468_v3, %s2144_s20 }
  0xb0   : > { %500 = vrot.lane.b32.xlu1 %v469_v6, %s2144_s20  ;;  %498 = vrot.lane.b32.xlu0 %v445_v7, %s2144_s20 }
  0xb4   : > { %516 = vrot.lane.b32.xlu1 %v436_v43, %s2145_s6  ;;  %514 = vrot.lane.b32.xlu0 %v462_v44, %s2145_s6 }
  0xb8   : > { %520 = vrot.lane.b32.xlu1 %v463_v48, %s2145_s6  ;;  %518 = vrot.lane.b32.xlu0 %v466_v49, %s2145_s6 }
  0xbc   : > { %524 = vrot.lane.b32.xlu1 %v467_v56, %s2145_s6  ;;  %522 = vrot.lane.b32.xlu0 %v439_v57, %s2145_s6 }
  0xc0   : > { %528 = vrot.lane.b32.xlu1 %v442_v60, %s2145_s6  ;;  %526 = vrot.lane.b32.xlu0 %v464_v61, %s2145_s6 }
  0xc4   : > { %532 = vrot.lane.b32.xlu1 %v465_v2, %s2145_s6  ;;  %530 = vrot.lane.b32.xlu0 %v468_v3, %s2145_s6 }
  0xc6   : > { %v281_v8 = vpop.permute.xlu1 %280  ;;  %v277_v9 = vpop.permute.xlu0 %276 }
  0xc8   : > { %536 = vrot.lane.b32.xlu1 %v469_v6, %s2145_s6  ;;  %534 = vrot.lane.b32.xlu0 %v445_v7, %s2145_s6 }
  0xca   : > { %v283_v10 = vpop.permute.xlu1 %282  ;;  %v279_v11 = vpop.permute.xlu0 %278 }
  0xcc   : > { %552 = vrot.lane.b32.xlu1 %v436_v43, %s2146_s14  ;;  %550 = vrot.lane.b32.xlu0 %v462_v44, %s2146_s14 }
  0xce   : > { %v287_v12 = vpop.permute.xlu1 %286  ;;  %v285_v13 = vpop.permute.xlu0 %284 }
  0xd0   : > { %556 = vrot.lane.b32.xlu1 %v463_v48, %s2146_s14  ;;  %554 = vrot.lane.b32.xlu0 %v466_v49, %s2146_s14 }
  0xd2   : > { %v291_v14 = vpop.permute.xlu1 %290  ;;  %v289_v15 = vpop.permute.xlu0 %288 }
  0xd4   : > { %560 = vrot.lane.b32.xlu1 %v467_v56, %s2146_s14  ;;  %558 = vrot.lane.b32.xlu0 %v439_v57, %s2146_s14 }
  0xd6   : > { %v295_v16 = vpop.permute.xlu1 %294  ;;  %v293_v17 = vpop.permute.xlu0 %292 }
  0xd8   : > { %564 = vrot.lane.b32.xlu1 %v442_v60, %s2146_s14  ;;  %562 = vrot.lane.b32.xlu0 %v464_v61, %s2146_s14 }
  0xda   : > { %v299_v18 = vpop.permute.xlu1 %298  ;;  %v297_v19 = vpop.permute.xlu0 %296 }
  0xdc   : > { %568 = vrot.lane.b32.xlu1 %v465_v2, %s2146_s14  ;;  %566 = vrot.lane.b32.xlu0 %v468_v3, %s2146_s14 }
  0xde   : > { %v315_v20 = vpop.permute.xlu1 %314  ;;  %v313_v21 = vpop.permute.xlu0 %312 }
  0xdf   : > { %v386_v32 = vsel %vm384_vm1, %v279_v11, %v315_v20  ;;  %v385_v33 = vsel %vm384_vm1, %v277_v9, %v313_v21 }
  0xe0   : > { %572 = vrot.lane.b32.xlu1 %v469_v6, %s2146_s14  ;;  %570 = vrot.lane.b32.xlu0 %v445_v7, %s2146_s14 }
  0xe2   : > { %v319_v22 = vpop.permute.xlu1 %318  ;;  %v317_v23 = vpop.permute.xlu0 %316 }
  0xe3   : > { %v388_v38 = vsel %vm384_vm1, %v283_v10, %v319_v22  ;;  %v387_v39 = vsel %vm384_vm1, %v281_v8, %v317_v23 }
  0xe6   : > { %v323_v24 = vpop.permute.xlu1 %322  ;;  %v321_v25 = vpop.permute.xlu0 %320 }
  0xe7   : > { %v390_v44 = vsel %vm384_vm1, %v287_v12, %v323_v24  ;;  %v389_v45 = vsel %vm384_vm1, %v285_v13, %v321_v25 }
  0xea   : > { %v327_v26 = vpop.permute.xlu1 %326  ;;  %v325_v27 = vpop.permute.xlu0 %324 }
  0xeb   : > { %v392_v50 = vsel %vm384_vm1, %v291_v14, %v327_v26  ;;  %v391_v51 = vsel %vm384_vm1, %v289_v15, %v325_v27 }
  0xee   : > { %v331_v28 = vpop.permute.xlu1 %330  ;;  %v329_v29 = vpop.permute.xlu0 %328 }
  0xef   : > { %v394_v56 = vsel %vm384_vm1, %v295_v16, %v331_v28  ;;  %v393_v57 = vsel %vm384_vm1, %v293_v17, %v329_v29 }
  0xf2   : > { %v335_v30 = vpop.permute.xlu1 %334  ;;  %v333_v31 = vpop.permute.xlu0 %332 }
  0xf3   : > { %v396_v62 = vsel %vm384_vm1, %v299_v18, %v335_v30  ;;  %v395_v63 = vsel %vm384_vm1, %v297_v19, %v333_v31 }
  0xf6   : > { %v351_v34 = vpop.permute.xlu1 %350  ;;  %v349_v35 = vpop.permute.xlu0 %348 }
  0xf7   : > { %v2458_v36 = vsel %vm397_vm2, %v386_v32, %v351_v34  ;;  %v2461_v37 = vsel %vm397_vm2, %v385_v33, %v349_v35 }
  0xf8   : > { %660 = vrot.lane.b32.xlu1 %v2458_v36, %s2144_s20  ;;  %658 = vrot.lane.b32.xlu0 %v2461_v37, %s2144_s20 }
  0xfa   : > { %v355_v40 = vpop.permute.xlu1 %354  ;;  %v353_v41 = vpop.permute.xlu0 %352 }
  0xfb   : > { %v2470_v42 = vsel %vm397_vm2, %v388_v38, %v355_v40  ;;  %v2473_v43 = vsel %vm397_vm2, %v387_v39, %v353_v41 }
  0xfc   : > { %664 = vrot.lane.b32.xlu1 %v2470_v42, %s2144_s20  ;;  %662 = vrot.lane.b32.xlu0 %v2473_v43, %s2144_s20 }
  0xfe   : > { %v359_v46 = vpop.permute.xlu1 %358  ;;  %v357_v47 = vpop.permute.xlu0 %356 }
  0xff   : > { %v2482_v48 = vsel %vm397_vm2, %v390_v44, %v359_v46  ;;  %v2485_v49 = vsel %vm397_vm2, %v389_v45, %v357_v47 }
 0x100   : > { %668 = vrot.lane.b32.xlu1 %v2482_v48, %s2144_s20  ;;  %666 = vrot.lane.b32.xlu0 %v2485_v49, %s2144_s20 }
 0x102   : > { %v363_v52 = vpop.permute.xlu1 %362  ;;  %v361_v53 = vpop.permute.xlu0 %360 }
 0x103   : > { %v2494_v54 = vsel %vm397_vm2, %v392_v50, %v363_v52  ;;  %v2497_v55 = vsel %vm397_vm2, %v391_v51, %v361_v53 }
 0x104   : > { %3680 = vst [vmem:[#allocation11_spill] sm:$0xff] %v2497_v55  ;;  %672 = vrot.lane.b32.xlu1 %v2494_v54, %s2144_s20  ;;  %670 = vrot.lane.b32.xlu0 %v2497_v55, %s2144_s20 }
 0x106   : > { %v367_v58 = vpop.permute.xlu1 %366  ;;  %v365_v59 = vpop.permute.xlu0 %364 }
 0x107   : > { %v2506_v60 = vsel %vm397_vm2, %v394_v56, %v367_v58  ;;  %v2509_v61 = vsel %vm397_vm2, %v393_v57, %v365_v59 }
 0x108   : > { %676 = vrot.lane.b32.xlu1 %v2506_v60, %s2144_s20  ;;  %674 = vrot.lane.b32.xlu0 %v2509_v61, %s2144_s20 }
 0x10a   : > { %v371_v0 = vpop.permute.xlu1 %370  ;;  %v369_v1 = vpop.permute.xlu0 %368 }
 0x10b   : > { %v2518_v2 = vsel %vm397_vm2, %v396_v62, %v371_v0  ;;  %v2521_v3 = vsel %vm397_vm2, %v395_v63, %v369_v1 }
 0x10c   : > { %680 = vrot.lane.b32.xlu1 %v2518_v2, %s2144_s20  ;;  %678 = vrot.lane.b32.xlu0 %v2521_v3, %s2144_s20 }
 0x10e   : > { %v481_v4 = vpop.permute.xlu1 %480  ;;  %v479_v5 = vpop.permute.xlu0 %478 }
 0x112   : > { %v485_v6 = vpop.permute.xlu1 %484  ;;  %v483_v7 = vpop.permute.xlu0 %482 }
 0x116   : > { %v489_v8 = vpop.permute.xlu1 %488  ;;  %v487_v9 = vpop.permute.xlu0 %486 }
 0x11a   : > { %v493_v10 = vpop.permute.xlu1 %492  ;;  %v491_v11 = vpop.permute.xlu0 %490 }
 0x11e   : > { %v497_v12 = vpop.permute.xlu1 %496  ;;  %v495_v13 = vpop.permute.xlu0 %494 }
 0x122   : > { %v501_v14 = vpop.permute.xlu1 %500  ;;  %v499_v15 = vpop.permute.xlu0 %498 }
 0x126   : > { %v517_v16 = vpop.permute.xlu1 %516  ;;  %v515_v17 = vpop.permute.xlu0 %514 }
 0x127   : > { %v587_v28 = vsel %vm384_vm1, %v481_v4, %v517_v16  ;;  %v586_v29 = vsel %vm384_vm1, %v479_v5, %v515_v17  ;;  %v2625_v16 = vmul.f32 %v2482_v48, %v2482_v48  ;;  %v2629_v17 = vmul.f32 %v2485_v49, %v2485_v49 }
 0x12a   : > { %v521_v18 = vpop.permute.xlu1 %520  ;;  %v519_v19 = vpop.permute.xlu0 %518 }
 0x12b   : > { %v589_v34 = vsel %vm384_vm1, %v485_v6, %v521_v18  ;;  %v588_v35 = vsel %vm384_vm1, %v483_v7, %v519_v19  ;;  %v2637_v18 = vmul.f32 %v2494_v54, %v2494_v54  ;;  %v2641_v19 = vmul.f32 %v2497_v55, %v2497_v55 }
 0x12e   : > { %v525_v20 = vpop.permute.xlu1 %524  ;;  %v523_v21 = vpop.permute.xlu0 %522 }
 0x12f   : > { %v591_v44 = vsel %vm384_vm1, %v489_v8, %v525_v20  ;;  %v590_v45 = vsel %vm384_vm1, %v487_v9, %v523_v21  ;;  %v2649_v20 = vmul.f32 %v2506_v60, %v2506_v60  ;;  %v2653_v21 = vmul.f32 %v2509_v61, %v2509_v61 }
 0x132   : > { %v529_v22 = vpop.permute.xlu1 %528  ;;  %v527_v23 = vpop.permute.xlu0 %526 }
 0x133   : > { %v593_v52 = vsel %vm384_vm1, %v493_v10, %v529_v22  ;;  %v592_v53 = vsel %vm384_vm1, %v491_v11, %v527_v23  ;;  %v2661_v22 = vmul.f32 %v2518_v2, %v2518_v2  ;;  %v2665_v23 = vmul.f32 %v2521_v3, %v2521_v3 }
 0x136   : > { %v533_v24 = vpop.permute.xlu1 %532  ;;  %v531_v25 = vpop.permute.xlu0 %530 }
 0x137   : > { %v595_v62 = vsel %vm384_vm1, %v497_v12, %v533_v24  ;;  %v594_v63 = vsel %vm384_vm1, %v495_v13, %v531_v25  ;;  %v2601_v12 = vmul.f32 %v2458_v36, %v2458_v36  ;;  %v2605_v13 = vmul.f32 %v2461_v37, %v2461_v37 }
 0x13a   : > { %v537_v26 = vpop.permute.xlu1 %536  ;;  %v535_v27 = vpop.permute.xlu0 %534 }
 0x13b   : > { %v597_v6 = vsel %vm384_vm1, %v501_v14, %v537_v26  ;;  %v596_v7 = vsel %vm384_vm1, %v499_v15, %v535_v27  ;;  %v2613_v14 = vmul.f32 %v2470_v42, %v2470_v42  ;;  %v2617_v15 = vmul.f32 %v2473_v43, %v2473_v43 }
 0x13e   : > { %v553_v30 = vpop.permute.xlu1 %552  ;;  %v551_v31 = vpop.permute.xlu0 %550 }
 0x13f   : > { %v2530_v32 = vsel %vm397_vm2, %v587_v28, %v553_v30  ;;  %v2533_v33 = vsel %vm397_vm2, %v586_v29, %v551_v31 }
 0x140   : > { %720 = vrot.lane.b32.xlu1 %v2530_v32, %s2144_s20  ;;  %718 = vrot.lane.b32.xlu0 %v2533_v33, %s2144_s20  ;;  %v2673_v24 = vmul.f32 %v2530_v32, %v2530_v32  ;;  %v2677_v25 = vmul.f32 %v2533_v33, %v2533_v33 }
 0x142   : > { %v557_v38 = vpop.permute.xlu1 %556  ;;  %v555_v39 = vpop.permute.xlu0 %554  ;;  %3685 = vst [vmem:[#allocation16_spill] sm:$0xff] %v2673_v24  ;;  %3686 = vst [vmem:[#allocation17_spill] sm:$0xff] %v2677_v25 }
 0x143   : > { %v2542_v40 = vsel %vm397_vm2, %v589_v34, %v557_v38  ;;  %v2545_v41 = vsel %vm397_vm2, %v588_v35, %v555_v39 }
 0x144   : > { %724 = vrot.lane.b32.xlu1 %v2542_v40, %s2144_s20  ;;  %722 = vrot.lane.b32.xlu0 %v2545_v41, %s2144_s20  ;;  %v2685_v26 = vmul.f32 %v2542_v40, %v2542_v40  ;;  %v2689_v27 = vmul.f32 %v2545_v41, %v2545_v41 }
 0x146   : > { %v561_v46 = vpop.permute.xlu1 %560  ;;  %v559_v47 = vpop.permute.xlu0 %558  ;;  %3687 = vst [vmem:[#allocation18_spill] sm:$0xff] %v2685_v26  ;;  %3688 = vst [vmem:[#allocation19_spill] sm:$0xff] %v2689_v27 }
 0x147   : > { %v2554_v50 = vsel %vm397_vm2, %v591_v44, %v561_v46  ;;  %v2557_v51 = vsel %vm397_vm2, %v590_v45, %v559_v47  ;;  %v2745_v44 = vmul.f32 %v2530_v32, %v2458_v36  ;;  %v2749_v45 = vmul.f32 %v2533_v33, %v2461_v37 }
 0x148   : > { %728 = vrot.lane.b32.xlu1 %v2554_v50, %s2144_s20  ;;  %726 = vrot.lane.b32.xlu0 %v2557_v51, %s2144_s20  ;;  %v2697_v28 = vmul.f32 %v2554_v50, %v2554_v50  ;;  %v2701_v29 = vmul.f32 %v2557_v51, %v2557_v51  ;;  %v2757_v46 = vmul.f32 %v2542_v40, %v2470_v42 }
 0x149   : > { %3697 = vst [vmem:[#allocation28_spill] sm:$0xff] %v2745_v44  ;;  %3698 = vst [vmem:[#allocation29_spill] sm:$0xff] %v2749_v45  ;;  %v2761_v47 = vmul.f32 %v2545_v41, %v2473_v43 }
 0x14a   : > { %v565_v56 = vpop.permute.xlu1 %564  ;;  %v563_v57 = vpop.permute.xlu0 %562  ;;  %3689 = vst [vmem:[#allocation20_spill] sm:$0xff] %v2697_v28  ;;  %3690 = vst [vmem:[#allocation21_spill] sm:$0xff] %v2701_v29 }
 0x14b   : > { %v2566_v58 = vsel %vm397_vm2, %v593_v52, %v565_v56  ;;  %v2569_v59 = vsel %vm397_vm2, %v592_v53, %v563_v57  ;;  %3699 = vst [vmem:[#allocation30_spill] sm:$0xff] %v2757_v46  ;;  %3700 = vst [vmem:[#allocation31_spill] sm:$0xff] %v2761_v47  ;;  %v2769_v52 = vmul.f32 %v2554_v50, %v2482_v48 }
 0x14c   : > { %732 = vrot.lane.b32.xlu1 %v2566_v58, %s2144_s20  ;;  %730 = vrot.lane.b32.xlu0 %v2569_v59, %s2144_s20  ;;  %v2709_v30 = vmul.f32 %v2566_v58, %v2566_v58  ;;  %v2713_v31 = vmul.f32 %v2569_v59, %v2569_v59  ;;  %v2773_v53 = vmul.f32 %v2557_v51, %v2485_v49 }
 0x14d   : > { %3701 = vst [vmem:[#allocation32_spill] sm:$0xff] %v2769_v52 }
 0x14e   : > { %v569_v0 = vpop.permute.xlu1 %568  ;;  %v567_v1 = vpop.permute.xlu0 %566  ;;  %3691 = vst [vmem:[#allocation22_spill] sm:$0xff] %v2709_v30  ;;  %3692 = vst [vmem:[#allocation23_spill] sm:$0xff] %v2713_v31 }
 0x14f   : > { %v2578_v4 = vsel %vm397_vm2, %v595_v62, %v569_v0  ;;  %v2581_v5 = vsel %vm397_vm2, %v594_v63, %v567_v1  ;;  %3702 = vst [vmem:[#allocation33_spill] sm:$0xff] %v2773_v53  ;;  %v2785_v62 = vmul.f32 %v2566_v58, %v2494_v54  ;;  %v2789_v63 = vmul.f32 %v2569_v59, %v2497_v55 }
 0x150   : > { %3681 = vst [vmem:[#allocation12_spill] sm:$0xff] %v2578_v4  ;;  %3682 = vst [vmem:[#allocation13_spill] sm:$0xff] %v2581_v5  ;;  %736 = vrot.lane.b32.xlu1 %v2578_v4, %s2144_s20  ;;  %734 = vrot.lane.b32.xlu0 %v2581_v5, %s2144_s20  ;;  %v2721_v34 = vmul.f32 %v2578_v4, %v2578_v4  ;;  %v2725_v35 = vmul.f32 %v2581_v5, %v2581_v5 }
 0x151   : > { %3705 = vst [vmem:[#allocation36_spill] sm:$0xff] %v2785_v62  ;;  %3706 = vst [vmem:[#allocation37_spill] sm:$0xff] %v2789_v63 }
 0x152   : > { %v573_v8 = vpop.permute.xlu1 %572  ;;  %v571_v9 = vpop.permute.xlu0 %570  ;;  %3693 = vst [vmem:[#allocation24_spill] sm:$0xff] %v2721_v34  ;;  %3694 = vst [vmem:[#allocation25_spill] sm:$0xff] %v2725_v35 }
 0x153   : > { %v2590_v10 = vsel %vm397_vm2, %v597_v6, %v573_v8  ;;  %v2593_v11 = vsel %vm397_vm2, %v596_v7, %v571_v9  ;;  %v2801_v6 = vmul.f32 %v2578_v4, %v2506_v60  ;;  %v2805_v7 = vmul.f32 %v2581_v5, %v2509_v61 }
 0x154   : > { %3683 = vst [vmem:[#allocation14_spill] sm:$0xff] %v2590_v10  ;;  %3684 = vst [vmem:[#allocation15_spill] sm:$0xff] %v2593_v11  ;;  %740 = vrot.lane.b32.xlu1 %v2590_v10, %s2144_s20  ;;  %738 = vrot.lane.b32.xlu0 %v2593_v11, %s2144_s20  ;;  %v2733_v38 = vmul.f32 %v2590_v10, %v2590_v10  ;;  %v2737_v39 = vmul.f32 %v2593_v11, %v2593_v11 }
 0x155   : > { %3709 = vst [vmem:[#allocation40_spill] sm:$0xff] %v2801_v6  ;;  %3710 = vst [vmem:[#allocation41_spill] sm:$0xff] %v2805_v7  ;;  %v2813_v8 = vmul.f32 %v2590_v10, %v2518_v2  ;;  %v2817_v9 = vmul.f32 %v2593_v11, %v2521_v3 }
 0x156   : > { %3695 = vst [vmem:[#allocation26_spill] sm:$0xff] %v2733_v38  ;;  %3696 = vst [vmem:[#allocation27_spill] sm:$0xff] %v2737_v39 }
 0x157   : > { %3711 = vst [vmem:[#allocation42_spill] sm:$0xff] %v2813_v8  ;;  %3712 = vst [vmem:[#allocation43_spill] sm:$0xff] %v2817_v9 }
 0x158   : > { %780 = vrot.lane.b32.xlu1 %v2601_v12, %s2144_s20  ;;  %778 = vrot.lane.b32.xlu0 %v2605_v13, %s2144_s20 }
 0x15c   : > { %784 = vrot.lane.b32.xlu1 %v2613_v14, %s2144_s20  ;;  %782 = vrot.lane.b32.xlu0 %v2617_v15, %s2144_s20 }
 0x160   : > { %788 = vrot.lane.b32.xlu1 %v2625_v16, %s2144_s20  ;;  %786 = vrot.lane.b32.xlu0 %v2629_v17, %s2144_s20 }
 0x164   : > { %792 = vrot.lane.b32.xlu1 %v2637_v18, %s2144_s20  ;;  %790 = vrot.lane.b32.xlu0 %v2641_v19, %s2144_s20 }
 0x168   : > { %796 = vrot.lane.b32.xlu1 %v2649_v20, %s2144_s20  ;;  %794 = vrot.lane.b32.xlu0 %v2653_v21, %s2144_s20 }
 0x16a   : > { %v2775_v56 = vpop.permute.xlu1 %660  ;;  %v2777_v57 = vpop.permute.xlu0 %658 }
 0x16b   : > { %3703 = vst [vmem:[#allocation34_spill] sm:$0xff] %v2775_v56  ;;  %3704 = vst [vmem:[#allocation35_spill] sm:$0xff] %v2777_v57 }
 0x16c   : > { %800 = vrot.lane.b32.xlu1 %v2661_v22, %s2144_s20  ;;  %798 = vrot.lane.b32.xlu0 %v2665_v23, %s2144_s20 }
 0x16e   : > { %v2795_v0 = vpop.permute.xlu1 %664  ;;  %v2797_v1 = vpop.permute.xlu0 %662 }
 0x16f   : > { %3707 = vst [vmem:[#allocation38_spill] sm:$0xff] %v2795_v0  ;;  %3708 = vst [vmem:[#allocation39_spill] sm:$0xff] %v2797_v1 }
 0x170   : > { %840 = vrot.lane.b32.xlu1 %v2673_v24, %s2144_s20  ;;  %838 = vrot.lane.b32.xlu0 %v2677_v25, %s2144_s20 }
 0x172   : > { %v2819_v0 = vpop.permute.xlu1 %668  ;;  %v2821_v1 = vpop.permute.xlu0 %666 }
 0x173   : > { %3713 = vst [vmem:[#allocation44_spill] sm:$0xff] %v2819_v0  ;;  %3714 = vst [vmem:[#allocation45_spill] sm:$0xff] %v2821_v1 }
 0x174   : > { %844 = vrot.lane.b32.xlu1 %v2685_v26, %s2144_s20  ;;  %842 = vrot.lane.b32.xlu0 %v2689_v27, %s2144_s20 }
 0x176   : > { %v2831_v57 = vpop.permute.xlu1 %672  ;;  %v2833_v56 = vpop.permute.xlu0 %670 }
 0x177   : > { %3715 = vst [vmem:[#allocation46_spill] sm:$0xff] %v2831_v57  ;;  %3716 = vst [vmem:[#allocation47_spill] sm:$0xff] %v2833_v56 }
 0x178   : > { %848 = vrot.lane.b32.xlu1 %v2697_v28, %s2144_s20  ;;  %846 = vrot.lane.b32.xlu0 %v2701_v29, %s2144_s20 }
 0x17a   : > { %v2839_v1 = vpop.permute.xlu1 %676  ;;  %v2841_v0 = vpop.permute.xlu0 %674 }
 0x17b   : > { %3717 = vst [vmem:[#allocation48_spill] sm:$0xff] %v2839_v1  ;;  %3718 = vst [vmem:[#allocation49_spill] sm:$0xff] %v2841_v0 }
 0x17c   : > { %852 = vrot.lane.b32.xlu1 %v2709_v30, %s2144_s20  ;;  %850 = vrot.lane.b32.xlu0 %v2713_v31, %s2144_s20 }
 0x17e   : > { %v2851_v56 = vpop.permute.xlu1 %680  ;;  %v2853_v57 = vpop.permute.xlu0 %678 }
 0x17f   : > { %3719 = vst [vmem:[#allocation50_spill] sm:$0xff] %v2851_v56  ;;  %3720 = vst [vmem:[#allocation51_spill] sm:$0xff] %v2853_v57 }
 0x180   : > { %856 = vrot.lane.b32.xlu1 %v2721_v34, %s2144_s20  ;;  %854 = vrot.lane.b32.xlu0 %v2725_v35, %s2144_s20 }
 0x184   : > { %860 = vrot.lane.b32.xlu1 %v2733_v38, %s2144_s20  ;;  %858 = vrot.lane.b32.xlu0 %v2737_v39, %s2144_s20 }
 0x188   : > { %900 = vrot.lane.b32.xlu1 %v2745_v44, %s2144_s20  ;;  %898 = vrot.lane.b32.xlu0 %v2749_v45, %s2144_s20 }
 0x18c   : > { %904 = vrot.lane.b32.xlu1 %v2757_v46, %s2144_s20  ;;  %902 = vrot.lane.b32.xlu0 %v2761_v47, %s2144_s20 }
 0x190   : > { %908 = vrot.lane.b32.xlu1 %v2769_v52, %s2144_s20  ;;  %906 = vrot.lane.b32.xlu0 %v2773_v53, %s2144_s20 }
 0x194   : > { %912 = vrot.lane.b32.xlu1 %v2785_v62, %s2144_s20  ;;  %910 = vrot.lane.b32.xlu0 %v2789_v63, %s2144_s20 }
 0x198   : > { %916 = vrot.lane.b32.xlu1 %v2801_v6, %s2144_s20  ;;  %914 = vrot.lane.b32.xlu0 %v2805_v7, %s2144_s20 }
 0x19c   : > { %920 = vrot.lane.b32.xlu1 %v2813_v8, %s2144_s20  ;;  %918 = vrot.lane.b32.xlu0 %v2817_v9, %s2144_s20 }
 0x1a0   : > { %948 = vrot.lane.b32.xlu1 %v2458_v36, %s2147_s17  ;;  %946 = vrot.lane.b32.xlu0 %v2461_v37, %s2147_s17 }
 0x1a4   : > { %952 = vrot.lane.b32.xlu1 %v2470_v42, %s2147_s17  ;;  %950 = vrot.lane.b32.xlu0 %v2473_v43, %s2147_s17 }
 0x1a8   : > { %956 = vrot.lane.b32.xlu1 %v2482_v48, %s2147_s17  ;;  %954 = vrot.lane.b32.xlu0 %v2485_v49, %s2147_s17 }
 0x1ac   : > { %960 = vrot.lane.b32.xlu1 %v2494_v54, %s2147_s17  ;;  %958 = vrot.lane.b32.xlu0 %v2497_v55, %s2147_s17 }
 0x1b0   : > { %1044 = vrot.lane.b32.xlu1 %v2601_v12, %s2147_s17  ;;  %1042 = vrot.lane.b32.xlu0 %v2605_v13, %s2147_s17 }
 0x1b2   : > { %v2859_v0 = vpop.permute.xlu1 %720  ;;  %v2861_v1 = vpop.permute.xlu0 %718 }
 0x1b3   : > { %3721 = vst [vmem:[#allocation52_spill] sm:$0xff] %v2859_v0  ;;  %3722 = vst [vmem:[#allocation53_spill] sm:$0xff] %v2861_v1 }
 0x1b4   : > { %1048 = vrot.lane.b32.xlu1 %v2613_v14, %s2147_s17  ;;  %1046 = vrot.lane.b32.xlu0 %v2617_v15, %s2147_s17 }
 0x1b6   : > { %v2867_v55 = vpop.permute.xlu1 %724  ;;  %v2869_v56 = vpop.permute.xlu0 %722 }
 0x1b7   : > { %3723 = vst [vmem:[#allocation54_spill] sm:$0xff] %v2867_v55  ;;  %3724 = vst [vmem:[#allocation55_spill] sm:$0xff] %v2869_v56 }
 0x1b8   : > { %1052 = vrot.lane.b32.xlu1 %v2625_v16, %s2147_s17  ;;  %1050 = vrot.lane.b32.xlu0 %v2629_v17, %s2147_s17 }
 0x1ba   : > { %v2875_v57 = vpop.permute.xlu1 %728  ;;  %v2877_v0 = vpop.permute.xlu0 %726 }
 0x1bb   : > { %3725 = vst [vmem:[#allocation56_spill] sm:$0xff] %v2875_v57  ;;  %3726 = vst [vmem:[#allocation57_spill] sm:$0xff] %v2877_v0 }
 0x1bc   : > { %1056 = vrot.lane.b32.xlu1 %v2637_v18, %s2147_s17  ;;  %1054 = vrot.lane.b32.xlu0 %v2641_v19, %s2147_s17 }
 0x1be   : > { %v2883_v1 = vpop.permute.xlu1 %732  ;;  %v2885_v55 = vpop.permute.xlu0 %730 }
 0x1bf   : > { %3727 = vst [vmem:[#allocation58_spill] sm:$0xff] %v2883_v1  ;;  %3728 = vst [vmem:[#allocation59_spill] sm:$0xff] %v2885_v55 }
 0x1c0   : > { %1060 = vrot.lane.b32.xlu1 %v2649_v20, %s2147_s17  ;;  %1058 = vrot.lane.b32.xlu0 %v2653_v21, %s2147_s17 }
 0x1c2   : > { %v2891_v56 = vpop.permute.xlu1 %736  ;;  %v2893_v57 = vpop.permute.xlu0 %734 }
 0x1c3   : > { %3729 = vst [vmem:[#allocation60_spill] sm:$0xff] %v2891_v56  ;;  %3730 = vst [vmem:[#allocation61_spill] sm:$0xff] %v2893_v57 }
 0x1c4   : > { %1064 = vrot.lane.b32.xlu1 %v2661_v22, %s2147_s17  ;;  %1062 = vrot.lane.b32.xlu0 %v2665_v23, %s2147_s17 }
 0x1c6   : > { %v2899_v0 = vpop.permute.xlu1 %740  ;;  %v2901_v1 = vpop.permute.xlu0 %738 }
 0x1c7   : > { %3731 = vst [vmem:[#allocation62_spill] sm:$0xff] %v2899_v0  ;;  %3732 = vst [vmem:[#allocation63_spill] sm:$0xff] %v2901_v1 }
 0x1c8   : > { %1092 = vrot.lane.b32.xlu1 %v2673_v24, %s2147_s17  ;;  %1090 = vrot.lane.b32.xlu0 %v2677_v25, %s2147_s17 }
 0x1ca   : > { %v2907_v55 = vpop.permute.xlu1 %780  ;;  %v2909_v56 = vpop.permute.xlu0 %778 }
 0x1cc   : > { %1096 = vrot.lane.b32.xlu1 %v2685_v26, %s2147_s17  ;;  %1094 = vrot.lane.b32.xlu0 %v2689_v27, %s2147_s17 }
 0x1ce   : > { %v2915_v57 = vpop.permute.xlu1 %784  ;;  %v2917_v0 = vpop.permute.xlu0 %782 }
 0x1d0   : > { %1100 = vrot.lane.b32.xlu1 %v2697_v28, %s2147_s17  ;;  %1098 = vrot.lane.b32.xlu0 %v2701_v29, %s2147_s17 }
 0x1d2   : > { %v2923_v1 = vpop.permute.xlu1 %788  ;;  %v2925_v25 = vpop.permute.xlu0 %786 }
 0x1d4   : > { %1104 = vrot.lane.b32.xlu1 %v2709_v30, %s2147_s17  ;;  %1102 = vrot.lane.b32.xlu0 %v2713_v31, %s2147_s17 }
 0x1d6   : > { %v2931_v26 = vpop.permute.xlu1 %792  ;;  %v2933_v27 = vpop.permute.xlu0 %790 }
 0x1d8   : > { %1108 = vrot.lane.b32.xlu1 %v2721_v34, %s2147_s17  ;;  %1106 = vrot.lane.b32.xlu0 %v2725_v35, %s2147_s17 }
 0x1da   : > { %v2939_v29 = vpop.permute.xlu1 %796  ;;  %v2941_v28 = vpop.permute.xlu0 %794 }
 0x1dc   : > { %1112 = vrot.lane.b32.xlu1 %v2733_v38, %s2147_s17  ;;  %1110 = vrot.lane.b32.xlu0 %v2737_v39, %s2147_s17 }
 0x1de   : > { %v2947_v31 = vpop.permute.xlu1 %800  ;;  %v2949_v30 = vpop.permute.xlu0 %798 }
 0x1e0   : > { %964 = vrot.lane.b32.xlu1 %v2506_v60, %s2147_s17  ;;  %962 = vrot.lane.b32.xlu0 %v2509_v61, %s2147_s17 }
 0x1e2   : > { %v2955_v35 = vpop.permute.xlu1 %840  ;;  %v2957_v34 = vpop.permute.xlu0 %838 }
 0x1e3   : > { %3733 = vst [vmem:[#allocation64_spill] sm:$0xff] %v2955_v35  ;;  %3734 = vst [vmem:[#allocation65_spill] sm:$0xff] %v2957_v34 }
 0x1e4   : > { %968 = vrot.lane.b32.xlu1 %v2518_v2, %s2147_s17  ;;  %966 = vrot.lane.b32.xlu0 %v2521_v3, %s2147_s17 }
 0x1e6   : > { %v2963_v39 = vpop.permute.xlu1 %844  ;;  %v2965_v38 = vpop.permute.xlu0 %842 }
 0x1e7   : > { %3735 = vst [vmem:[#allocation66_spill] sm:$0xff] %v2963_v39  ;;  %3736 = vst [vmem:[#allocation67_spill] sm:$0xff] %v2965_v38 }
 0x1e8   : > { %996 = vrot.lane.b32.xlu1 %v2530_v32, %s2147_s17  ;;  %994 = vrot.lane.b32.xlu0 %v2533_v33, %s2147_s17 }
 0x1ea   : > { %v2971_v24 = vpop.permute.xlu1 %848  ;;  %v2973_v35 = vpop.permute.xlu0 %846 }
 0x1eb   : > { %3737 = vst [vmem:[#allocation68_spill] sm:$0xff] %v2971_v24  ;;  %3738 = vst [vmem:[#allocation69_spill] sm:$0xff] %v2973_v35 }
 0x1ec   : > { %1000 = vrot.lane.b32.xlu1 %v2542_v40, %s2147_s17  ;;  %998 = vrot.lane.b32.xlu0 %v2545_v41, %s2147_s17 }
 0x1ee   : > { %v2979_v34 = vpop.permute.xlu1 %852  ;;  %v2981_v39 = vpop.permute.xlu0 %850 }
 0x1ef   : > { %3739 = vst [vmem:[#allocation70_spill] sm:$0xff] %v2979_v34  ;;  %3740 = vst [vmem:[#allocation71_spill] sm:$0xff] %v2981_v39 }
 0x1f0   : > { %1004 = vrot.lane.b32.xlu1 %v2554_v50, %s2147_s17  ;;  %1002 = vrot.lane.b32.xlu0 %v2557_v51, %s2147_s17 }
 0x1f2   : > { %v2987_v38 = vpop.permute.xlu1 %856  ;;  %v2989_v24 = vpop.permute.xlu0 %854 }
 0x1f3   : > { %3741 = vst [vmem:[#allocation72_spill] sm:$0xff] %v2987_v38  ;;  %3742 = vst [vmem:[#allocation73_spill] sm:$0xff] %v2989_v24 }
 0x1f4   : > { %1008 = vrot.lane.b32.xlu1 %v2566_v58, %s2147_s17  ;;  %1006 = vrot.lane.b32.xlu0 %v2569_v59, %s2147_s17 }
 0x1f6   : > { %v2995_v35 = vpop.permute.xlu1 %860  ;;  %v2997_v34 = vpop.permute.xlu0 %858 }
 0x1f7   : > { %3743 = vst [vmem:[#allocation74_spill] sm:$0xff] %v2995_v35  ;;  %3744 = vst [vmem:[#allocation75_spill] sm:$0xff] %v2997_v34 }
 0x1f8   : > { %1012 = vrot.lane.b32.xlu1 %v2578_v4, %s2147_s17  ;;  %1010 = vrot.lane.b32.xlu0 %v2581_v5, %s2147_s17 }
 0x1fa   : > { %v3003_v39 = vpop.permute.xlu1 %900  ;;  %v3005_v38 = vpop.permute.xlu0 %898 }
 0x1fb   : > { %3745 = vst [vmem:[#allocation76_spill] sm:$0xff] %v3003_v39  ;;  %3746 = vst [vmem:[#allocation77_spill] sm:$0xff] %v3005_v38 }
 0x1fc   : > { %1016 = vrot.lane.b32.xlu1 %v2590_v10, %s2147_s17  ;;  %1014 = vrot.lane.b32.xlu0 %v2593_v11, %s2147_s17 }
 0x1fe   : > { %v3011_v24 = vpop.permute.xlu1 %904  ;;  %v3013_v35 = vpop.permute.xlu0 %902 }
 0x1ff   : > { %3747 = vst [vmem:[#allocation78_spill] sm:$0xff] %v3011_v24  ;;  %3748 = vst [vmem:[#allocation79_spill] sm:$0xff] %v3013_v35 }
 0x200   : > { %1140 = vrot.lane.b32.xlu1 %v2745_v44, %s2147_s17  ;;  %1138 = vrot.lane.b32.xlu0 %v2749_v45, %s2147_s17 }
 0x202   : > { %v3019_v5 = vpop.permute.xlu1 %908  ;;  %v3021_v39 = vpop.permute.xlu0 %906 }
 0x203   : > { %3749 = vst [vmem:[#allocation80_spill] sm:$0xff] %v3019_v5  ;;  %3750 = vst [vmem:[#allocation81_spill] sm:$0xff] %v3021_v39 }
 0x204   : > { %1144 = vrot.lane.b32.xlu1 %v2757_v46, %s2147_s17  ;;  %1142 = vrot.lane.b32.xlu0 %v2761_v47, %s2147_s17 }
 0x206   : > { %v3027_v38 = vpop.permute.xlu1 %912  ;;  %v3029_v24 = vpop.permute.xlu0 %910 }
 0x207   : > { %3751 = vst [vmem:[#allocation82_spill] sm:$0xff] %v3027_v38  ;;  %3752 = vst [vmem:[#allocation83_spill] sm:$0xff] %v3029_v24 }
 0x208   : > { %1148 = vrot.lane.b32.xlu1 %v2769_v52, %s2147_s17  ;;  %1146 = vrot.lane.b32.xlu0 %v2773_v53, %s2147_s17 }
 0x20a   : > { %v3035_v35 = vpop.permute.xlu1 %916  ;;  %v3037_v5 = vpop.permute.xlu0 %914 }
 0x20b   : > { %3753 = vst [vmem:[#allocation84_spill] sm:$0xff] %v3035_v35  ;;  %3754 = vst [vmem:[#allocation85_spill] sm:$0xff] %v3037_v5  ;;  %v3757_v35 = vld [vmem:[#allocation34_spill] sm:$0xff]  ;;  %v3758_v5 = vld [vmem:[#allocation35_spill] sm:$0xff] }
 0x20c   : > { %1152 = vrot.lane.b32.xlu1 %v2785_v62, %s2147_s17  ;;  %1150 = vrot.lane.b32.xlu0 %v2789_v63, %s2147_s17  ;;  %v695_v24 = vadd.f32 %v3757_v35, %v2458_v36  ;;  %v694_v53 = vadd.f32 %v3758_v5, %v2461_v37  ;;  %v3760_v37 = vld [vmem:[#allocation38_spill] sm:$0xff] }
 0x20d   : > { %v697_v5 = vadd.f32 %v3760_v37, %v2470_v42 }
 0x20e   : > { %v3043_v39 = vpop.permute.xlu1 %920  ;;  %v3045_v38 = vpop.permute.xlu0 %918 }
 0x20f   : > { %3755 = vst [vmem:[#allocation86_spill] sm:$0xff] %v3043_v39  ;;  %3756 = vst [vmem:[#allocation87_spill] sm:$0xff] %v3045_v38  ;;  %v3759_v39 = vld [vmem:[#allocation39_spill] sm:$0xff] }
 0x210   : > { %1156 = vrot.lane.b32.xlu1 %v2801_v6, %s2147_s17  ;;  %1154 = vrot.lane.b32.xlu0 %v2805_v7, %s2147_s17  ;;  %v696_v46 = vadd.f32 %v3759_v39, %v2473_v43 }
 0x212   : > { %v949_v62 = vpop.permute.xlu1 %948  ;;  %v947_v52 = vpop.permute.xlu0 %946 }
 0x213   : > { %v983_v47 = vadd.f32 %v949_v62, %v695_v24  ;;  %v982_v63 = vadd.f32 %v947_v52, %v694_v53 }
 0x214   : > { %1160 = vrot.lane.b32.xlu1 %v2813_v8, %s2147_s17  ;;  %1158 = vrot.lane.b32.xlu0 %v2817_v9, %s2147_s17  ;;  %v3761_v8 = vld [vmem:[#allocation44_spill] sm:$0xff]  ;;  %v3762_v9 = vld [vmem:[#allocation45_spill] sm:$0xff] }
 0x215   : > { %v1200_v38 = vrot.slane %v983_v47, 1  ;;  %v1237_v36 = vrot.slane %v983_v47, 2  ;;  %v1199_v35 = vrot.slane %v982_v63, 1  ;;  %v1236_v7 = vrot.slane %v982_v63, 2 }
 0x216   : > { %v953_v24 = vpop.permute.xlu1 %952  ;;  %v951_v52 = vpop.permute.xlu0 %950  ;;  %v699_v45 = vadd.f32 %v3761_v8, %v2482_v48  ;;  %v698_v44 = vadd.f32 %v3762_v9, %v2485_v49  ;;  %v3764_v49 = vld [vmem:[#allocation46_spill] sm:$0xff] }
 0x217   : > { %v1201_v53 = vsel %vm1198_vm3, %v1199_v35, %v1200_v38  ;;  %v1238_v43 = vsel %vm1235_vm4, %v1236_v7, %v1237_v36  ;;  %v984_v39 = vadd.f32 %v951_v52, %v696_v46  ;;  %v985_v6 = vadd.f32 %v953_v24, %v697_v5 }
 0x218   : > { %v1227_v62 = vadd.f32 %v1201_v53, %v982_v63  ;;  %v701_v9 = vadd.f32 %v3764_v49, %v2494_v54  ;;  %v815_v54 = vadd.f32 %v2907_v55, %v2601_v12  ;;  %v817_v55 = vadd.f32 %v2915_v57, %v2613_v14 }
 0x219   : > { %v1202_v11 = vrot.slane %v984_v39, 1  ;;  %v1239_v10 = vrot.slane %v984_v39, 2  ;;  %v1204_v63 = vrot.slane %v985_v6, 1  ;;  %v1241_v5 = vrot.slane %v985_v6, 2  ;;  %v3766_v39 = vld [vmem:[#allocation47_spill] sm:$0xff] }
 0x21a   : > { %v3069_v34 = vadd.f32 %v1238_v43, %v1227_v62  ;;  %v957_v42 = vpop.permute.xlu1 %956  ;;  %v955_v37 = vpop.permute.xlu0 %954  ;;  %v3765_v43 = vld [vmem:[#allocation11_spill] sm:$0xff]  ;;  %v816_v12 = vadd.f32 %v2917_v0, %v2617_v15 }
 0x21b   : > { %v1203_v4 = vsel %vm1198_vm3, %v1200_v38, %v1202_v11  ;;  %v1240_v35 = vsel %vm1235_vm4, %v1237_v36, %v1239_v10  ;;  %v987_v7 = vadd.f32 %v957_v42, %v699_v45  ;;  %v986_v46 = vadd.f32 %v955_v37, %v698_v44 }
 0x21c   : > { %3763 = vst [vmem:[#allocation34_spill] sm:$0xff] %v3069_v34  ;;  %v1228_v24 = vadd.f32 %v1203_v4, %v983_v47  ;;  %v700_v62 = vadd.f32 %v3766_v39, %v3765_v43  ;;  %v814_v37 = vadd.f32 %v2909_v56, %v2605_v13 }
 0x21d   : > { %v1207_v52 = vrot.slane %v987_v7, 1  ;;  %v1244_v48 = vrot.slane %v987_v7, 2  ;;  %v1205_v8 = vrot.slane %v986_v46, 1  ;;  %v1242_v53 = vrot.slane %v986_v46, 2 }
 0x21e   : > { %v3077_v34 = vadd.f32 %v1240_v35, %v1228_v24  ;;  %v961_v11 = vpop.permute.xlu1 %960  ;;  %v959_v38 = vpop.permute.xlu0 %958 }
 0x21f   : > { %v1206_v10 = vsel %vm1198_vm3, %v1204_v63, %v1205_v8  ;;  %v1208_v44 = vsel %vm1198_vm3, %v1205_v8, %v1207_v52  ;;  %v1243_v4 = vsel %vm1235_vm4, %v1241_v5, %v1242_v53  ;;  %v1245_v45 = vsel %vm1235_vm4, %v1242_v53, %v1244_v48 }
 0x220   : > { %v1229_v47 = vadd.f32 %v1206_v10, %v985_v6  ;;  %v1230_v36 = vadd.f32 %v1208_v44, %v986_v46  ;;  %v3083_v42 = vadd.f32 %v961_v11, %v701_v9  ;;  %v988_v35 = vadd.f32 %v959_v38, %v700_v62 }
 0x221   : > { %v819_v44 = vadd.f32 %v2923_v1, %v2625_v16 }
 0x222   : > { %v3089_v7 = vadd.f32 %v1243_v4, %v1229_v47  ;;  %v3091_v63 = vadd.f32 %v1245_v45, %v1230_v36  ;;  %v1210_v24 = vrot.slane %v3083_v42, 1  ;;  %v1247_v5 = vrot.slane %v3083_v42, 2  ;;  %v1045_v52 = vpop.permute.xlu1 %1044  ;;  %v1043_v6 = vpop.permute.xlu0 %1042  ;;  %v3767_v36 = vld [vmem:[#allocation48_spill] sm:$0xff] }
 0x223   : > { %v1209_v46 = vrot.slane %v988_v35, 1  ;;  %v1246_v48 = vrot.slane %v988_v35, 2  ;;  %v1079_v8 = vadd.f32 %v1045_v52, %v815_v54  ;;  %v1078_v53 = vadd.f32 %v1043_v6, %v814_v37  ;;  %v3768_v37 = vld [vmem:[#allocation49_spill] sm:$0xff] }
 0x224   : > { %v818_v4 = vadd.f32 %v2925_v25, %v2629_v17  ;;  %v3115_v54 = vadd.f32 %v3767_v36, %v2506_v60  ;;  %v822_v36 = vadd.f32 %v2941_v28, %v2653_v21  ;;  %v3774_v21 = vld [vmem:[#allocation55_spill] sm:$0xff] }
 0x225   : > { %v1211_v13 = vsel %vm1198_vm3, %v1209_v46, %v1210_v24  ;;  %v1248_v56 = vsel %vm1235_vm4, %v1246_v48, %v1247_v5  ;;  %v1369_v49 = vrot.slane %v1079_v8, 1  ;;  %v1405_v9 = vrot.slane %v1079_v8, 2 }
 0x226   : > { %v1231_v43 = vadd.f32 %v1211_v13, %v988_v35  ;;  %v1368_v39 = vrot.slane %v1078_v53, 1  ;;  %v1404_v62 = vrot.slane %v1078_v53, 2  ;;  %v1049_v11 = vpop.permute.xlu1 %1048  ;;  %v1047_v38 = vpop.permute.xlu0 %1046  ;;  %v3119_v35 = vadd.f32 %v3768_v37, %v2509_v61  ;;  %v3769_v61 = vld [vmem:[#allocation50_spill] sm:$0xff] }
 0x227   : > { %v1081_v10 = vadd.f32 %v1049_v11, %v817_v55  ;;  %v1080_v14 = vadd.f32 %v1047_v38, %v816_v12  ;;  %v3165_v28 = vadd.f32 %v3774_v21, %v2545_v41 }
 0x228   : > { %v3105_v57 = vadd.f32 %v1248_v56, %v1231_v43  ;;  %v1370_v15 = vsel %vm1198_vm3, %v1368_v39, %v1369_v49  ;;  %v1406_v0 = vsel %vm1235_vm4, %v1404_v62, %v1405_v9  ;;  %v3127_v39 = vadd.f32 %v3769_v61, %v2518_v2 }
 0x229   : > { %v1396_v45 = vadd.f32 %v1370_v15, %v1078_v53  ;;  %v1371_v47 = vrot.slane %v1080_v14, 1  ;;  %v1407_v52 = vrot.slane %v1080_v14, 2  ;;  %v1373_v17 = vrot.slane %v1081_v10, 1 }
 0x22a   : > { %v1053_v6 = vpop.permute.xlu1 %1052  ;;  %v1051_v46 = vpop.permute.xlu0 %1050  ;;  %v1409_v25 = vrot.slane %v1081_v10, 2  ;;  %v821_v62 = vadd.f32 %v2931_v26, %v2637_v18  ;;  %v3770_v18 = vld [vmem:[#allocation51_spill] sm:$0xff] }
 0x22b   : > { %v3121_v48 = vadd.f32 %v1406_v0, %v1396_v45  ;;  %v1372_v16 = vsel %vm1198_vm3, %v1369_v49, %v1371_v47  ;;  %v1083_v1 = vadd.f32 %v1053_v6, %v819_v44  ;;  %v1082_v55 = vadd.f32 %v1051_v46, %v818_v4 }
 0x22c   : > { %v1397_v53 = vadd.f32 %v1372_v16, %v1079_v8  ;;  %v1408_v12 = vsel %vm1235_vm4, %v1405_v9, %v1407_v52  ;;  %v820_v49 = vadd.f32 %v2933_v27, %v2641_v19  ;;  %v3141_v26 = vadd.f32 %v3770_v18, %v2521_v3  ;;  %v3771_v19 = vld [vmem:[#allocation52_spill] sm:$0xff] }
 0x22d   : > { %v1376_v60 = vrot.slane %v1083_v1, 1  ;;  %v1412_v13 = vrot.slane %v1083_v1, 2  ;;  %v1374_v56 = vrot.slane %v1082_v55, 1  ;;  %v1410_v43 = vrot.slane %v1082_v55, 2 }
 0x22e   : > { %v3133_v11 = vadd.f32 %v1408_v12, %v1397_v53  ;;  %v1057_v38 = vpop.permute.xlu1 %1056  ;;  %v1055_v8 = vpop.permute.xlu0 %1054  ;;  %v3145_v27 = vadd.f32 %v3771_v19, %v2530_v32  ;;  %v823_v47 = vadd.f32 %v2939_v29, %v2649_v20  ;;  %v3772_v32 = vld [vmem:[#allocation53_spill] sm:$0xff]  ;;  %v3773_v20 = vld [vmem:[#allocation54_spill] sm:$0xff]  ;;  %v3775_v53 = vld [vmem:[#allocation56_spill] sm:$0xff] }
 0x22f   : > { %v1375_v9 = vsel %vm1198_vm3, %v1373_v17, %v1374_v56  ;;  %v1377_v14 = vsel %vm1198_vm3, %v1374_v56, %v1376_v60  ;;  %v1411_v15 = vsel %vm1235_vm4, %v1409_v25, %v1410_v43  ;;  %v1413_v0 = vsel %vm1235_vm4, %v1410_v43, %v1412_v13  ;;  %v3780_v19 = vld [vmem:[#allocation59_spill] sm:$0xff] }
 0x230   : > { %v1398_v2 = vadd.f32 %v1375_v9, %v1081_v10  ;;  %v1399_v44 = vadd.f32 %v1377_v14, %v1082_v55  ;;  %v1085_v4 = vadd.f32 %v1057_v38, %v821_v62  ;;  %v1084_v45 = vadd.f32 %v1055_v8, %v820_v49  ;;  %v3777_v38 = vld [vmem:[#allocation58_spill] sm:$0xff] }
 0x231   : > { %v3157_v25 = vadd.f32 %v3772_v32, %v2533_v33  ;;  %v3161_v29 = vadd.f32 %v3773_v20, %v2542_v40  ;;  %v3169_v12 = vadd.f32 %v3775_v53, %v2554_v50  ;;  %v825_v60 = vadd.f32 %v2947_v31, %v2661_v22  ;;  %v3776_v40 = vld [vmem:[#allocation57_spill] sm:$0xff]  ;;  %v3778_v22 = vld [vmem:[#allocation16_spill] sm:$0xff] }
 0x232   : > { %v3151_v37 = vadd.f32 %v1411_v15, %v1398_v2  ;;  %v3153_v10 = vadd.f32 %v1413_v0, %v1399_v44  ;;  %v1379_v52 = vrot.slane %v1085_v4, 1  ;;  %v1415_v6 = vrot.slane %v1085_v4, 2  ;;  %v1061_v46 = vpop.permute.xlu1 %1060  ;;  %v1059_v16 = vpop.permute.xlu0 %1058  ;;  %v3779_v31 = vld [vmem:[#allocation64_spill] sm:$0xff] }
 0x233   : > { %v1378_v3 = vrot.slane %v1084_v45, 1  ;;  %v1414_v1 = vrot.slane %v1084_v45, 2  ;;  %v1087_v55 = vadd.f32 %v1061_v46, %v823_v47  ;;  %v1086_v17 = vadd.f32 %v1059_v16, %v822_v36  ;;  %v3781_v47 = vld [vmem:[#allocation17_spill] sm:$0xff] }
 0x234   : > { %v824_v13 = vadd.f32 %v2949_v30, %v2665_v23  ;;  %v3179_v43 = vadd.f32 %v3776_v40, %v2557_v51  ;;  %v3183_v8 = vadd.f32 %v3777_v38, %v2566_v58  ;;  %v875_v23 = vadd.f32 %v3779_v31, %v3778_v22  ;;  %v3782_v36 = vld [vmem:[#allocation65_spill] sm:$0xff]  ;;  %v3788_v38 = vld [vmem:[#allocation66_spill] sm:$0xff] }
 0x235   : > { %v1380_v33 = vsel %vm1198_vm3, %v1378_v3, %v1379_v52  ;;  %v1416_v56 = vsel %vm1235_vm4, %v1414_v1, %v1415_v6  ;;  %v1381_v61 = vrot.slane %v1086_v17, 1  ;;  %v1417_v62 = vrot.slane %v1086_v17, 2 }
 0x236   : > { %v1400_v41 = vadd.f32 %v1380_v33, %v1084_v45  ;;  %v1065_v49 = vpop.permute.xlu1 %1064  ;;  %v1063_v50 = vpop.permute.xlu0 %1062  ;;  %v1383_v15 = vrot.slane %v1087_v55, 1  ;;  %v3193_v58 = vadd.f32 %v3780_v19, %v2569_v59  ;;  %v874_v46 = vadd.f32 %v3782_v36, %v3781_v47  ;;  %v3793_v47 = vld [vmem:[#allocation22_spill] sm:$0xff] }
 0x237   : > { %v1089_v30 = vadd.f32 %v1065_v49, %v825_v60  ;;  %v1088_v9 = vadd.f32 %v1063_v50, %v824_v13  ;;  %v1382_v51 = vsel %vm1198_vm3, %v1379_v52, %v1381_v61  ;;  %v1418_v0 = vsel %vm1235_vm4, %v1415_v6, %v1417_v62  ;;  %v3783_v60 = vld [vmem:[#allocation19_spill] sm:$0xff]  ;;  %v3785_v61 = vld [vmem:[#allocation12_spill] sm:$0xff]  ;;  %v3787_v50 = vld [vmem:[#allocation18_spill] sm:$0xff] }
 0x238   : > { %v3187_v14 = vadd.f32 %v1416_v56, %v1400_v41  ;;  %v1401_v2 = vadd.f32 %v1382_v51, %v1085_v4  ;;  %v1419_v16 = vrot.slane %v1087_v55, 2  ;;  %v3784_v13 = vld [vmem:[#allocation67_spill] sm:$0xff]  ;;  %v3786_v62 = vld [vmem:[#allocation60_spill] sm:$0xff]  ;;  %v877_v22 = vadd.f32 %v3788_v38, %v3787_v50  ;;  %v3794_v36 = vld [vmem:[#allocation70_spill] sm:$0xff] }
 0x239   : > { %v1386_v44 = vrot.slane %v1089_v30, 1  ;;  %v1422_v45 = vrot.slane %v1089_v30, 2  ;;  %v1384_v18 = vrot.slane %v1088_v9, 1  ;;  %v1420_v3 = vrot.slane %v1088_v9, 2 }
 0x23a   : > { %v1093_v1 = vpop.permute.xlu1 %1092  ;;  %v1091_v17 = vpop.permute.xlu0 %1090  ;;  %v3197_v32 = vadd.f32 %v1418_v0, %v1401_v2  ;;  %v876_v33 = vadd.f32 %v3784_v13, %v3783_v60  ;;  %v3207_v49 = vadd.f32 %v3786_v62, %v3785_v61  ;;  %v3802_v61 = vld [vmem:[#allocation74_spill] sm:$0xff] }
 0x23b   : > { %v1385_v52 = vsel %vm1198_vm3, %v1383_v15, %v1384_v18  ;;  %v1387_v4 = vsel %vm1198_vm3, %v1384_v18, %v1386_v44  ;;  %v1127_v6 = vadd.f32 %v1093_v1, %v875_v23  ;;  %v1421_v53 = vsel %vm1235_vm4, %v1419_v16, %v1420_v3  ;;  %v3790_v15 = vld [vmem:[#allocation68_spill] sm:$0xff]  ;;  %v3792_v18 = vld [vmem:[#allocation69_spill] sm:$0xff]  ;;  %v3795_v16 = vld [vmem:[#allocation23_spill] sm:$0xff] }
 0x23c   : > { %v1402_v20 = vadd.f32 %v1385_v52, %v1087_v55  ;;  %v1403_v21 = vadd.f32 %v1387_v4, %v1088_v9  ;;  %v1423_v59 = vsel %vm1235_vm4, %v1420_v3, %v1422_v45  ;;  %v1126_v41 = vadd.f32 %v1091_v17, %v874_v46  ;;  %v3789_v9 = vld [vmem:[#allocation20_spill] sm:$0xff]  ;;  %v3791_v45 = vld [vmem:[#allocation21_spill] sm:$0xff]  ;;  %v3796_v3 = vld [vmem:[#allocation71_spill] sm:$0xff] }
 0x23d   : > { %v1453_v56 = vrot.slane %v1127_v6, 1  ;;  %v1489_v40 = vrot.slane %v1127_v6, 2  ;;  %v879_v51 = vadd.f32 %v3790_v15, %v3789_v9  ;;  %v878_v19 = vadd.f32 %v3792_v18, %v3791_v45  ;;  %v3797_v52 = vld [vmem:[#allocation24_spill] sm:$0xff]  ;;  %v3805_v18 = vld [vmem:[#allocation34_spill] sm:$0xff] }
 0x23e   : > { %v3211_v31 = vadd.f32 %v1421_v53, %v1402_v20  ;;  %v3213_v55 = vadd.f32 %v1423_v59, %v1403_v21  ;;  %v1097_v23 = vpop.permute.xlu1 %1096  ;;  %v1095_v30 = vpop.permute.xlu0 %1094  ;;  %v1452_v0 = vrot.slane %v1126_v41, 1  ;;  %v1488_v2 = vrot.slane %v1126_v41, 2  ;;  %v3798_v4 = vld [vmem:[#allocation72_spill] sm:$0xff]  ;;  %v3799_v21 = vld [vmem:[#allocation25_spill] sm:$0xff] }
 0x23f   : > { %v1128_v44 = vadd.f32 %v1095_v30, %v876_v33  ;;  %v881_v46 = vadd.f32 %v3794_v36, %v3793_v47  ;;  %v880_v1 = vadd.f32 %v3796_v3, %v3795_v16  ;;  %v1129_v17 = vadd.f32 %v1097_v23, %v877_v22  ;;  %v3800_v53 = vld [vmem:[#allocation73_spill] sm:$0xff]  ;;  %v3801_v33 = vld [vmem:[#allocation26_spill] sm:$0xff]  ;;  %v3803_v22 = vld [vmem:[#allocation27_spill] sm:$0xff] }
 0x240   : > { %v883_v20 = vadd.f32 %v3798_v4, %v3797_v52  ;;  %v882_v59 = vadd.f32 %v3800_v53, %v3799_v21  ;;  %v1454_v60 = vsel %vm1198_vm3, %v1452_v0, %v1453_v56  ;;  %v1490_v13 = vsel %vm1235_vm4, %v1488_v2, %v1489_v40  ;;  %v3804_v23 = vld [vmem:[#allocation75_spill] sm:$0xff] }
 0x241   : > { %v3231_v62 = vadd.f32 %v3802_v61, %v3801_v33  ;;  %v1480_v50 = vadd.f32 %v1454_v60, %v1126_v41  ;;  %v1455_v38 = vrot.slane %v1128_v44, 1  ;;  %v1491_v30 = vrot.slane %v1128_v44, 2 }
 0x242   : > { %v1101_v9 = vpop.permute.xlu1 %1100  ;;  %v1099_v15 = vpop.permute.xlu0 %1098  ;;  %v884_v45 = vadd.f32 %v3804_v23, %v3803_v22  ;;  %v3237_v47 = vmul.f32 %v3805_v18, %v3805_v18  ;;  %v1457_v2 = vrot.slane %v1129_v17, 1  ;;  %v3243_v53 = vmul.f32 %v3077_v34, %v3077_v34 }
 0x243   : > { %v1131_v36 = vadd.f32 %v1101_v9, %v879_v51  ;;  %v1130_v0 = vadd.f32 %v1099_v15, %v878_v19  ;;  %v1516_v16 = vadd.f32 %v1490_v13, %v1480_v50  ;;  %v1456_v3 = vsel %vm1198_vm3, %v1453_v56, %v1455_v38 }
 0x244   : > { %v1492_v52 = vsel %vm1235_vm4, %v1489_v40, %v1491_v30  ;;  %v1481_v41 = vadd.f32 %v1456_v3, %v1127_v6  ;;  %v1493_v33 = vrot.slane %v1129_v17, 2 }
 0x245   : > { %v1460_v4 = vrot.slane %v1131_v36, 1  ;;  %v1496_v44 = vrot.slane %v1131_v36, 2  ;;  %v1458_v21 = vrot.slane %v1130_v0, 1  ;;  %v1696_v60 = vadd.f32 %v1516_v16, %v3121_v48 }
 0x246   : > { %v1494_v61 = vrot.slane %v1130_v0, 2  ;;  %v1105_v51 = vpop.permute.xlu1 %1104  ;;  %v1103_v19 = vpop.permute.xlu0 %1102  ;;  %v1517_v13 = vadd.f32 %v1492_v52, %v1481_v41 }
 0x247   : > { %v1459_v50 = vsel %vm1198_vm3, %v1457_v2, %v1458_v21  ;;  %v1461_v56 = vsel %vm1198_vm3, %v1458_v21, %v1460_v4  ;;  %v1133_v40 = vadd.f32 %v1105_v51, %v881_v46  ;;  %v3248_v6 = vmul.f32 9.0, %v1696_v60 }
 0x248   : > { %v1482_v38 = vadd.f32 %v1459_v50, %v1129_v17  ;;  %v1483_v30 = vadd.f32 %v1461_v56, %v1130_v0  ;;  %v1495_v9 = vsel %vm1235_vm4, %v1493_v33, %v1494_v61  ;;  %v1697_v15 = vadd.f32 %v1517_v13, %v3133_v11 }
 0x249   : > { %v1497_v48 = vsel %vm1235_vm4, %v1494_v61, %v1496_v44  ;;  %v1463_v22 = vrot.slane %v1133_v40, 1  ;;  %v1499_v23 = vrot.slane %v1133_v40, 2  ;;  %v1132_v3 = vadd.f32 %v1103_v19, %v880_v1 }
 0x24a   : > { %v1518_v16 = vadd.f32 %v1495_v9, %v1482_v38  ;;  %v1519_v2 = vadd.f32 %v1497_v48, %v1483_v30  ;;  %v1109_v52 = vpop.permute.xlu1 %1108  ;;  %v1107_v46 = vpop.permute.xlu0 %1106  ;;  %v3257_v17 = vmul.f32 %v3089_v7, %v3089_v7  ;;  %v3259_v0 = vmul.f32 9.0, %v1697_v15 }
 0x24b   : > { %v1135_v41 = vadd.f32 %v1109_v52, %v883_v20  ;;  %v1134_v11 = vadd.f32 %v1107_v46, %v882_v59  ;;  %v1462_v21 = vrot.slane %v1132_v3, 1  ;;  %v1498_v60 = vrot.slane %v1132_v3, 2 }
 0x24c   : > { %v1698_v4 = vadd.f32 %v1518_v16, %v3151_v37  ;;  %v1699_v44 = vadd.f32 %v1519_v2, %v3153_v10  ;;  %v3265_v33 = vmul.f32 %v3091_v63, %v3091_v63 }
 0x24d   : > { %v1467_v61 = vrot.slane %v1135_v41, 1  ;;  %v1465_v51 = vrot.slane %v1134_v11, 1  ;;  %v1464_v20 = vsel %vm1198_vm3, %v1462_v21, %v1463_v22  ;;  %v1500_v37 = vsel %vm1235_vm4, %v1498_v60, %v1499_v23 }
 0x24e   : > { %v3269_v19 = vmul.f32 9.0, %v1698_v4  ;;  %v3271_v13 = vmul.f32 9.0, %v1699_v44  ;;  %v1113_v10 = vpop.permute.xlu1 %1112  ;;  %v1111_v59 = vpop.permute.xlu0 %1110  ;;  %v1484_v50 = vadd.f32 %v1464_v20, %v1132_v3  ;;  %v1501_v38 = vrot.slane %v1134_v11, 2 }
 0x24f   : > { %v1466_v56 = vsel %vm1198_vm3, %v1463_v22, %v1465_v51  ;;  %v1137_v30 = vadd.f32 %v1113_v10, %v3231_v62  ;;  %v1136_v16 = vadd.f32 %v1111_v59, %v884_v45  ;;  %v1503_v44 = vrot.slane %v1135_v41, 2  ;;  %v3806_v62 = vld [vmem:[#allocation13_spill] sm:$0xff] }
 0x250   : > { %v1485_v48 = vadd.f32 %v1466_v56, %v1133_v40  ;;  %v1520_v2 = vadd.f32 %v1500_v37, %v1484_v50  ;;  %v1502_v52 = vsel %vm1235_vm4, %v1499_v23, %v1501_v38  ;;  %v3807_v51 = vld [vmem:[#allocation61_spill] sm:$0xff]  ;;  %v3288_v10 = vmul.f32 %v3105_v57, %v3105_v57 }
 0x251   : > { %v1470_v46 = vrot.slane %v1137_v30, 1  ;;  %v1506_v4 = vrot.slane %v1137_v30, 2  ;;  %v1468_v21 = vrot.slane %v1136_v16, 1  ;;  %v1504_v22 = vrot.slane %v1136_v16, 2 }
 0x252   : > { %v1521_v3 = vadd.f32 %v1502_v52, %v1485_v48  ;;  %v965_v11 = vpop.permute.xlu1 %964  ;;  %v963_v60 = vpop.permute.xlu0 %962  ;;  %v3284_v20 = vadd.f32 %v3807_v51, %v3806_v62  ;;  %v1700_v45 = vadd.f32 %v1520_v2, %v3187_v14  ;;  %v3808_v52 = vld [vmem:[#allocation14_spill] sm:$0xff]  ;;  %v3810_v14 = vld [vmem:[#allocation15_spill] sm:$0xff] }
 0x253   : > { %v990_v40 = vadd.f32 %v963_v60, %v3119_v35  ;;  %v1469_v37 = vsel %vm1198_vm3, %v1467_v61, %v1468_v21  ;;  %v1471_v59 = vsel %vm1198_vm3, %v1468_v21, %v1470_v46  ;;  %v1505_v50 = vsel %vm1235_vm4, %v1503_v44, %v1504_v22  ;;  %v3809_v62 = vld [vmem:[#allocation62_spill] sm:$0xff]  ;;  %v3811_v35 = vld [vmem:[#allocation63_spill] sm:$0xff]  ;;  %v3813_v61 = vld [vmem:[#allocation76_spill] sm:$0xff] }
 0x254   : > { %v1701_v23 = vadd.f32 %v1521_v3, %v3197_v32  ;;  %v3296_v56 = vmul.f32 9.0, %v1700_v45  ;;  %v1486_v38 = vadd.f32 %v1469_v37, %v1135_v41  ;;  %v1487_v30 = vadd.f32 %v1471_v59, %v1136_v16  ;;  %v3812_v32 = vld [vmem:[#allocation28_spill] sm:$0xff] }
 0x255   : > { %v1507_v48 = vsel %vm1235_vm4, %v1504_v22, %v1506_v4  ;;  %v3301_v51 = vadd.f32 %v3809_v62, %v3808_v52  ;;  %v3305_v2 = vadd.f32 %v3811_v35, %v3810_v14  ;;  %v3309_v3 = vadd.f32 %v3813_v61, %v3812_v32  ;;  %v3814_v52 = vld [vmem:[#allocation29_spill] sm:$0xff]  ;;  %v3820_v61 = vld [vmem:[#allocation32_spill] sm:$0xff] }
 0x256   : > { %v1212_v46 = vrot.slane %v990_v40, 1  ;;  %v969_v44 = vpop.permute.xlu1 %968  ;;  %v967_v21 = vpop.permute.xlu0 %966  ;;  %v1522_v16 = vadd.f32 %v1505_v50, %v1486_v38  ;;  %v1523_v4 = vadd.f32 %v1507_v48, %v1487_v30  ;;  %v1249_v22 = vrot.slane %v990_v40, 2  ;;  %v3815_v62 = vld [vmem:[#allocation77_spill] sm:$0xff]  ;;  %v3819_v30 = vld [vmem:[#allocation79_spill] sm:$0xff] }
 0x257   : > { %v991_v60 = vadd.f32 %v965_v11, %v3115_v54  ;;  %v993_v37 = vadd.f32 %v969_v44, %v3127_v39  ;;  %v992_v59 = vadd.f32 %v967_v21, %v3141_v26  ;;  %v3321_v14 = vadd.f32 %v3815_v62, %v3814_v52  ;;  %v3816_v54 = vld [vmem:[#allocation30_spill] sm:$0xff]  ;;  %v3825_v62 = vld [vmem:[#allocation36_spill] sm:$0xff] }
 0x258   : > { %v1213_v45 = vsel %vm1198_vm3, %v1210_v24, %v1212_v46  ;;  %v1702_v35 = vadd.f32 %v1522_v16, %v3211_v31  ;;  %v3325_v50 = vadd.f32 %v1523_v4, %v3213_v55  ;;  %v3817_v11 = vld [vmem:[#allocation78_spill] sm:$0xff]  ;;  %v3818_v24 = vld [vmem:[#allocation31_spill] sm:$0xff]  ;;  %v1250_v26 = vsel %vm1235_vm4, %v1247_v5, %v1249_v22  ;;  %v3821_v55 = vld [vmem:[#allocation80_spill] sm:$0xff] }
 0x259   : > { %v1232_v40 = vadd.f32 %v1213_v45, %v3083_v42  ;;  %v3330_v38 = vadd.f32 %v3817_v11, %v3816_v54  ;;  %v3334_v39 = vadd.f32 %v3819_v30, %v3818_v24  ;;  %v1215_v48 = vrot.slane %v992_v59, 1  ;;  %v3822_v4 = vld [vmem:[#allocation33_spill] sm:$0xff]  ;;  %v3826_v42 = vld [vmem:[#allocation82_spill] sm:$0xff]  ;;  %v3829_v22 = vld [vmem:[#allocation83_spill] sm:$0xff] }
 0x25a   : > { %v997_v32 = vpop.permute.xlu1 %996  ;;  %v995_v31 = vpop.permute.xlu0 %994  ;;  %v3341_v46 = vadd.f32 %v3821_v55, %v3820_v61  ;;  %v1217_v21 = vrot.slane %v993_v37, 1  ;;  %v3823_v45 = vld [vmem:[#allocation81_spill] sm:$0xff]  ;;  %v3352_v54 = vadd.f32 %v3826_v42, %v3825_v62  ;;  %v1214_v24 = vrot.slane %v991_v60, 1  ;;  %v3831_v30 = vld [vmem:[#allocation40_spill] sm:$0xff]  ;;  %v3838_v62 = vld [vmem:[#allocation86_spill] sm:$0xff] }
 0x25b   : > { %v3343_v44 = vadd.f32 %v1250_v26, %v1232_v40  ;;  %v1031_v16 = vadd.f32 %v997_v32, %v3145_v27  ;;  %v3348_v52 = vadd.f32 %v3823_v45, %v3822_v4  ;;  %v3828_v5 = vld [vmem:[#allocation37_spill] sm:$0xff]  ;;  %v3832_v61 = vld [vmem:[#allocation84_spill] sm:$0xff]  ;;  %v3366_v32 = vmul.f32 9.0, %v1701_v23  ;;  %v3837_v45 = vld [vmem:[#allocation42_spill] sm:$0xff] }
 0x25c   : > { %3827 = vst [vmem:[#allocation39_spill] sm:$0xff] %v3352_v54  ;;  %v3356_v11 = vadd.f32 %v3829_v22, %v3828_v5  ;;  %v3360_v40 = vadd.f32 %v3832_v61, %v3831_v30  ;;  %v3834_v26 = vld [vmem:[#allocation41_spill] sm:$0xff]  ;;  %v3374_v42 = vadd.f32 %v3838_v62, %v3837_v45  ;;  %v1216_v5 = vsel %vm1198_vm3, %v1214_v24, %v1215_v48  ;;  %v3840_v62 = vld [vmem:[#allocation43_spill] sm:$0xff] }
 0x25d   : > { %3824 = vst [vmem:[#allocation35_spill] sm:$0xff] %v3348_v52  ;;  %v3835_v55 = vld [vmem:[#allocation85_spill] sm:$0xff]  ;;  %v3370_v4 = vmul.f32 %v3343_v44, %v3343_v44  ;;  %v1285_v22 = vrot.slane %v1031_v16, 1  ;;  %v1030_v30 = vadd.f32 %v995_v31, %v3157_v25  ;;  %v1254_v23 = vrot.slane %v993_v37, 2 }
 0x25e   : > { %3830 = vst [vmem:[#allocation38_spill] sm:$0xff] %v3356_v11  ;;  %3833 = vst [vmem:[#allocation44_spill] sm:$0xff] %v3360_v40  ;;  %v3364_v27 = vadd.f32 %v3835_v55, %v3834_v26  ;;  %v1001_v61 = vpop.permute.xlu1 %1000  ;;  %v999_v41 = vpop.permute.xlu0 %998  ;;  %v1218_v55 = vsel %vm1198_vm3, %v1215_v48, %v1217_v21  ;;  %v1252_v15 = vrot.slane %v992_v59, 2  ;;  %v1321_v9 = vrot.slane %v1031_v16, 2 }
 0x25f   : > { %3839 = vst [vmem:[#allocation46_spill] sm:$0xff] %v3374_v42  ;;  %v1284_v1 = vrot.slane %v1030_v30, 1  ;;  %v1320_v36 = vrot.slane %v1030_v30, 2  ;;  %v1032_v45 = vadd.f32 %v999_v41, %v3165_v28  ;;  %v3841_v42 = vld [vmem:[#allocation87_spill] sm:$0xff]  ;;  %v3386_v40 = vmul.f32 9.0, %v1702_v35 }
 0x260   : > { %3836 = vst [vmem:[#allocation45_spill] sm:$0xff] %v3364_v27  ;;  %v3384_v24 = vadd.f32 %v3841_v42, %v3840_v62  ;;  %v1251_v25 = vrot.slane %v991_v60, 2  ;;  %v1233_v31 = vadd.f32 %v1216_v5, %v991_v60  ;;  %v1033_v37 = vadd.f32 %v1001_v61, %v3161_v29 }
 0x261   : > { %v1286_v27 = vsel %vm1198_vm3, %v1284_v1, %v1285_v22  ;;  %v1287_v26 = vrot.slane %v1032_v45, 1  ;;  %v1323_v48 = vrot.slane %v1032_v45, 2  ;;  %v1234_v54 = vadd.f32 %v1218_v55, %v992_v59 }
 0x262   : > { %v1005_v21 = vpop.permute.xlu1 %1004  ;;  %v1003_v11 = vpop.permute.xlu0 %1002  ;;  %v1253_v52 = vsel %vm1235_vm4, %v1251_v25, %v1252_v15  ;;  %v1312_v28 = vadd.f32 %v1286_v27, %v1030_v30  ;;  %v1255_v42 = vsel %vm1235_vm4, %v1252_v15, %v1254_v23  ;;  %v1322_v35 = vsel %vm1235_vm4, %v1320_v36, %v1321_v9 }
 0x263   : > { %v1035_v41 = vadd.f32 %v1005_v21, %v3169_v12  ;;  %v1288_v60 = vsel %vm1198_vm3, %v1285_v22, %v1287_v26  ;;  %v1034_v1 = vadd.f32 %v1003_v11, %v3179_v43  ;;  %v3396_v5 = vadd.f32 %v1253_v52, %v1233_v31 }
 0x264   : > { %v1348_v29 = vadd.f32 %v1322_v35, %v1312_v28  ;;  %v1313_v61 = vadd.f32 %v1288_v60, %v1031_v16  ;;  %v1289_v62 = vrot.slane %v1033_v37, 1  ;;  %v1324_v59 = vsel %vm1235_vm4, %v1321_v9, %v1323_v48 }
 0x265   : > { %v1292_v45 = vrot.slane %v1035_v41, 1  ;;  %v1290_v55 = vrot.slane %v1034_v1, 1  ;;  %v1326_v27 = vrot.slane %v1034_v1, 2  ;;  %v3399_v25 = vadd.f32 %v1255_v42, %v1234_v54 }
 0x266   : > { %v1009_v30 = vpop.permute.xlu1 %1008  ;;  %v1007_v12 = vpop.permute.xlu0 %1006  ;;  %v1624_v15 = vmul.f32 %v1348_v29, %v1348_v29  ;;  %v1349_v36 = vadd.f32 %v1324_v59, %v1313_v61  ;;  %v1328_v23 = vrot.slane %v1035_v41, 2  ;;  %v1325_v22 = vrot.slane %v1033_v37, 2 }
 0x267   : > { %v1291_v43 = vsel %vm1198_vm3, %v1289_v62, %v1290_v55  ;;  %v1293_v52 = vsel %vm1198_vm3, %v1290_v55, %v1292_v45  ;;  %v3404_v16 = vadd.f32 %v1009_v30, %v3183_v8  ;;  %v3408_v9 = vmul.f32 %v3396_v5, %v3396_v5 }
 0x268   : > { %v1608_v11 = vmul.f32 %v1348_v29, %v3805_v18  ;;  %v1680_v54 = vadd.f32 %v1624_v15, %v3237_v47  ;;  %v3842_v26 = vsub.f32 %v3248_v6, %v3237_v47  ;;  %v1625_v48 = vmul.f32 %v1349_v36, %v1349_v36 }
 0x269   : > { %v1314_v21 = vadd.f32 %v1291_v43, %v1033_v37  ;;  %v1315_v28 = vadd.f32 %v1293_v52, %v1034_v1  ;;  %v1327_v41 = vsel %vm1235_vm4, %v1325_v22, %v1326_v27  ;;  %v1329_v61 = vsel %vm1235_vm4, %v1326_v27, %v1328_v23 }
 0x26a   : > { %v1720_v31 = vsub.f32 %v3842_v26, %v1624_v15  ;;  %v1013_v42 = vpop.permute.xlu1 %1012  ;;  %v1011_v8 = vpop.permute.xlu0 %1010  ;;  %v1688_v35 = vadd.f32 0.0081, %v1680_v54  ;;  %v1036_v45 = vadd.f32 %v1007_v12, %v3193_v58  ;;  %v1681_v18 = vadd.f32 %v1625_v48, %v3243_v53 }
 0x26b   : > { %v3843_v29 = vsub.f32 %v3259_v0, %v3243_v53  ;;  %v1350_v6 = vadd.f32 %v1327_v41, %v1314_v21  ;;  %v1295_v37 = vrot.slane %v3404_v16, 1  ;;  %v1609_v62 = vmul.f32 %v1349_v36, %v3077_v34 }
 0x26c   : > { %v1728_v60 = vadd.f32 0.0729, %v1720_v31  ;;  %v1351_v59 = vadd.f32 %v1329_v61, %v1315_v28  ;;  %v1294_v55 = vrot.slane %v1036_v45, 1  ;;  %v3426_v30 = vmul.f32 %v3399_v25, %v3399_v25 }
 0x26d   : > { %v1721_v47 = vsub.f32 %v3843_v29, %v1625_v48  ;;  %v3428_v27 = vmul.f32 2.0, %v1608_v11  ;;  %v1689_v58 = vadd.f32 0.0081, %v1681_v18  ;;  %v3431_v15 = vmul.f32 9.0, %v3325_v50 }
 0x26e   : > { %v1736_v1 = vmul.f32 %v1728_v60, %v1688_v35  ;;  %v1626_v53 = vmul.f32 %v1350_v6, %v1350_v6  ;;  %v1627_v0 = vmul.f32 %v1351_v59, %v1351_v59  ;;  %v1331_v23 = vrot.slane %v3404_v16, 2  ;;  %v1017_v22 = vpop.permute.xlu1 %1016  ;;  %v1015_v54 = vpop.permute.xlu0 %1014 }
 0x26f   : > { %v1729_v12 = vadd.f32 0.0729, %v1721_v47  ;;  %v1718_v34 = vsub.f32 %v3386_v40, %v3408_v9  ;;  %v1296_v43 = vsel %vm1198_vm3, %v1294_v55, %v1295_v37  ;;  %v1330_v52 = vrot.slane %v1036_v45, 2 }
 0x270   : > { %v3437_v11 = vmul.f32 2.0, %v1609_v62  ;;  %v1682_v26 = vadd.f32 %v1626_v53, %v3257_v17  ;;  %v1683_v50 = vadd.f32 %v1627_v0, %v3265_v33  ;;  %v3844_v31 = vsub.f32 %v3269_v19, %v3257_v17 }
 0x271   : > { %v1737_v36 = vmul.f32 %v1729_v12, %v1689_v58  ;;  %v1719_v21 = vsub.f32 %v3431_v15, %v3426_v30  ;;  %v3447_v28 = vadd.f32 0.0081, %v3428_v27  ;;  %v3845_v41 = vsub.f32 %v3271_v13, %v3265_v33 }
 0x272   : > { %v1722_v48 = vsub.f32 %v3844_v31, %v1626_v53  ;;  %v1316_v60 = vadd.f32 %v1296_v43, %v1036_v45  ;;  %v1610_v61 = vmul.f32 %v1350_v6, %v3089_v7  ;;  %v1690_v18 = vadd.f32 0.0081, %v1682_v26  ;;  %v1141_v45 = vpop.permute.xlu1 %1140 }
 0x273   : > { %v1723_v35 = vsub.f32 %v3845_v41, %v1627_v0  ;;  %v1691_v29 = vadd.f32 0.0081, %v1683_v50  ;;  %v1332_v47 = vsel %vm1235_vm4, %v1330_v52, %v1331_v23  ;;  %v1611_v17 = vmul.f32 %v1351_v59, %v3091_v63  ;;  %v1139_v0 = vpop.permute.xlu0 %1138 }
 0x274   : > { %v1730_v19 = vadd.f32 0.0729, %v1722_v48  ;;  %v1352_v55 = vadd.f32 %v1332_v47, %v1316_v60  ;;  %v3456_v58 = vadd.f32 0.0081, %v3437_v11  ;;  %v1039_v12 = vadd.f32 %v1013_v42, %v3207_v49 }
 0x275   : > { %v1731_v62 = vadd.f32 0.0729, %v1723_v35  ;;  %v1038_v33 = vadd.f32 %v1011_v8, %v3284_v20  ;;  %v1041_v13 = vadd.f32 %v1017_v22, %v3301_v51  ;;  %1998 = vrcp.f32 %v1736_v1 }
 0x276   : > { %v1738_v7 = vmul.f32 %v1730_v19, %v1690_v18  ;;  %v1628_v53 = vmul.f32 %v1352_v55, %v1352_v55  ;;  %v3461_v43 = vmul.f32 2.0, %v1610_v61  ;;  %v1040_v52 = vadd.f32 %v1015_v54, %v3305_v2 }
 0x277   : > { %v1739_v6 = vmul.f32 %v1731_v62, %v1691_v29  ;;  %v1297_v63 = vrot.slane %v1038_v33, 1  ;;  %v1333_v59 = vrot.slane %v1038_v33, 2  ;;  %v3464_v26 = vmul.f32 2.0, %v1611_v17  ;;  %v1143_v29 = vpop.permute.xlu0 %1142 }
 0x278   : > { %v1684_v49 = vadd.f32 %v1628_v53, %v3288_v10  ;;  %v3846_v20 = vsub.f32 %v3296_v56, %v3288_v10  ;;  %v3471_v42 = vadd.f32 %v1141_v45, %v3309_v3  ;;  %v1612_v8 = vmul.f32 %v1352_v55, %v3105_v57  ;;  %v1145_v56 = vpop.permute.xlu1 %1144 }
 0x279   : > { %v1299_v1 = vrot.slane %v1039_v12, 1  ;;  %v1298_v22 = vsel %vm1198_vm3, %v1295_v37, %v1297_v63  ;;  %v1302_v50 = vrot.slane %v1041_v13, 1  ;;  %v1335_v2 = vrot.slane %v1039_v12, 2 }
 0x27a   : > { %v1724_v51 = vsub.f32 %v3846_v20, %v1628_v53  ;;  %v1692_v31 = vadd.f32 0.0081, %v1684_v49  ;;  %v1317_v54 = vadd.f32 %v1298_v22, %v3404_v16  ;;  %v1334_v41 = vsel %vm1235_vm4, %v1331_v23, %v1333_v59 }
 0x27b   : > { %v1338_v35 = vrot.slane %v1041_v13, 2  ;;  %v1300_v60 = vrot.slane %v1040_v52, 1  ;;  %v1336_v10 = vrot.slane %v1040_v52, 2  ;;  %v1537_v18 = vrot.slane %v3471_v42, 1  ;;  %v1147_v22 = vpop.permute.xlu0 %1146 }
 0x27c   : > { %v1732_v48 = vadd.f32 0.0729, %v1724_v51  ;;  %v1353_v3 = vadd.f32 %v1334_v41, %v1317_v54  ;;  %v1174_v57 = vadd.f32 %v1139_v0, %v3321_v14  ;;  %v1573_v16 = vrot.slane %v3471_v42, 2  ;;  %v1149_v49 = vpop.permute.xlu1 %1148 }
 0x27d   : > { %v1301_v37 = vsel %vm1198_vm3, %v1299_v1, %v1300_v60  ;;  %v1303_v47 = vsel %vm1198_vm3, %v1300_v60, %v1302_v50  ;;  %v1339_v17 = vsel %vm1235_vm4, %v1336_v10, %v1338_v35  ;;  %2000 = vrcp.f32 %v1737_v36 }
 0x27e   : > { %v1740_v61 = vmul.f32 %v1732_v48, %v1692_v31  ;;  %v1629_v23 = vmul.f32 %v1353_v3, %v1353_v3  ;;  %v1318_v19 = vadd.f32 %v1301_v37, %v1039_v12  ;;  %v1337_v62 = vsel %vm1235_vm4, %v1335_v2, %v1336_v10 }
 0x27f   : > { %v1613_v55 = vmul.f32 %v1353_v3, %v3343_v44  ;;  %v1319_v33 = vadd.f32 %v1303_v47, %v1040_v52  ;;  %v1536_v13 = vrot.slane %v1174_v57, 1  ;;  %v1572_v45 = vrot.slane %v1174_v57, 2 }
 0x280   : > { %v3486_v14 = vadd.f32 0.0081, %v3461_v43  ;;  %v1685_v53 = vadd.f32 %v1629_v23, %v3370_v4  ;;  %v3847_v0 = vsub.f32 %v3366_v32, %v3370_v4  ;;  %v1354_v59 = vadd.f32 %v1337_v62, %v1318_v19 }
 0x281   : > { %v3492_v36 = vmul.f32 2.0, %v1612_v8  ;;  %v3494_v12 = vadd.f32 %v1339_v17, %v1319_v33  ;;  %v1538_v44 = vsel %vm1198_vm3, %v1536_v13, %v1537_v18  ;;  %v1574_v52 = vsel %vm1235_vm4, %v1572_v45, %v1573_v16 }
 0x282   : > { %v1725_v63 = vsub.f32 %v3847_v0, %v1629_v23  ;;  %2002 = vrcp.f32 %v1738_v7  ;;  %v1693_v20 = vadd.f32 0.0081, %v1685_v53  ;;  %v1177_v1 = vadd.f32 %v1145_v56, %v3330_v38  ;;  %v1999_v32 = vpop.eup %1998 }
 0x283   : > { %v3501_v4 = vmul.f32 2.0, %v1613_v55  ;;  %v1630_v8 = vmul.f32 %v1354_v59, %v1354_v59  ;;  %v1631_v50 = vmul.f32 %v3494_v12, %v3494_v12  ;;  %v1564_v31 = vadd.f32 %v1538_v44, %v1174_v57  ;;  %v3849_v44 = vld [vmem:[#allocation39_spill] sm:$0xff] }
 0x284   : > { %v1733_v51 = vadd.f32 0.0729, %v1725_v63  ;;  %v3506_v48 = vadd.f32 0.0081, %v3464_v26  ;;  %2004 = vrcp.f32 %v1739_v6  ;;  %v1176_v7 = vadd.f32 %v1143_v29, %v3334_v39  ;;  %v1153_v29 = vpop.permute.xlu1 %1152 }
 0x285   : > { %v3510_v54 = vadd.f32 0.0081, %v3492_v36  ;;  %v1686_v38 = vadd.f32 %v1630_v8, %v3408_v9  ;;  %v1687_v41 = vadd.f32 %v1631_v50, %v3426_v30  ;;  %v1726_v35 = vsub.f32 %v1718_v34, %v1630_v8  ;;  %v1151_v9 = vpop.permute.xlu0 %1150  ;;  %v3848_v30 = vld [vmem:[#allocation35_spill] sm:$0xff] }
 0x286   : > { %v1741_v2 = vmul.f32 %v1733_v51, %v1693_v20  ;;  %2006 = vrcp.f32 %v1740_v61  ;;  %v1727_v60 = vsub.f32 %v1719_v21, %v1631_v50  ;;  %v1600_v6 = vadd.f32 %v1574_v52, %v1564_v31 }
 0x287   : > { %v1541_v10 = vrot.slane %v1177_v1, 1  ;;  %v3521_v39 = vadd.f32 0.0081, %v3501_v4  ;;  %v1694_v56 = vadd.f32 0.0081, %v1686_v38  ;;  %v1179_v57 = vadd.f32 %v1149_v49, %v3341_v46  ;;  %v3850_v49 = vld [vmem:[#allocation38_spill] sm:$0xff] }
 0x288   : > { %v1695_v3 = vadd.f32 0.0081, %v1687_v41  ;;  %v1734_v37 = vadd.f32 0.0729, %v1726_v35  ;;  %v1735_v47 = vadd.f32 0.0729, %v1727_v60  ;;  %v1178_v15 = vadd.f32 %v1147_v22, %v3848_v30  ;;  %v1157_v8 = vpop.permute.xlu1 %1156 }
 0x289   : > { %v1648_v17 = vmul.f32 18.0, %v1600_v6  ;;  %v1539_v40 = vrot.slane %v1176_v7, 1  ;;  %v1575_v34 = vrot.slane %v1176_v7, 2  ;;  %v1544_v61 = vrot.slane %v1179_v57, 1  ;;  %v1155_v7 = vpop.permute.xlu0 %1154 }
 0x28a   : > { %v1580_v23 = vrot.slane %v1179_v57, 2  ;;  %v1742_v21 = vmul.f32 %v1734_v37, %v1694_v56  ;;  %v3525_v19 = vmul.f32 %v1735_v47, %v1695_v3  ;;  %v2001_v55 = vpop.eup %2000  ;;  %v1542_v45 = vrot.slane %v1178_v15, 1  ;;  %v3851_v57 = vld [vmem:[#allocation45_spill] sm:$0xff] }
 0x28b   : > { %v1656_v62 = vsub.f32 %v1648_v17, %v3428_v27  ;;  %v1540_v46 = vsel %vm1198_vm3, %v1537_v18, %v1539_v40  ;;  %v1576_v13 = vsel %vm1235_vm4, %v1573_v16, %v1575_v34  ;;  %v1578_v53 = vrot.slane %v1178_v15, 2 }
 0x28c   : > { %v1565_v33 = vadd.f32 %v1540_v46, %v3471_v42  ;;  %v1577_v63 = vrot.slane %v1177_v1, 2  ;;  %v1181_v52 = vadd.f32 %v1153_v29, %v3849_v44  ;;  %v1180_v20 = vadd.f32 %v1151_v9, %v3850_v49 }
 0x28d   : > { %v1664_v0 = vadd.f32 0.0729, %v1656_v62  ;;  %v3536_v51 = vmul.f32 %v1354_v59, %v3396_v5  ;;  %v1543_v22 = vsel %vm1198_vm3, %v1541_v10, %v1542_v45  ;;  %v1545_v18 = vsel %vm1198_vm3, %v1542_v45, %v1544_v61 }
 0x28e   : > { %v1601_v27 = vadd.f32 %v1576_v13, %v1565_v33  ;;  %v1566_v16 = vadd.f32 %v1543_v22, %v1177_v1  ;;  %v1567_v50 = vadd.f32 %v1545_v18, %v1178_v15  ;;  %v1579_v31 = vsel %vm1235_vm4, %v1577_v63, %v1578_v53  ;;  %v3852_v15 = vld [vmem:[#allocation44_spill] sm:$0xff]  ;;  %v3853_v63 = vld [vmem:[#allocation46_spill] sm:$0xff] }
 0x28f   : > { %v1672_v42 = vmul.f32 %v1664_v0, %v3447_v28  ;;  %v2003_v38 = vpop.eup %2002  ;;  %v1581_v35 = vsel %vm1235_vm4, %v1578_v53, %v1580_v23  ;;  %v1547_v5 = vrot.slane %v1181_v52, 1  ;;  %v1583_v59 = vrot.slane %v1181_v52, 2  ;;  %v1161_v23 = vpop.permute.xlu1 %1160 }
 0x290   : > { %v1649_v41 = vmul.f32 18.0, %v1601_v27  ;;  %v1602_v6 = vadd.f32 %v1579_v31, %v1566_v16  ;;  %v1603_v10 = vadd.f32 %v1581_v35, %v1567_v50  ;;  %v1546_v56 = vrot.slane %v1180_v20, 1 }
 0x291   : > { %v1752_v60 = vmul.f32 %v1999_v32, %v1672_v42  ;;  %v2005_v3 = vpop.eup %2004  ;;  %2008 = vrcp.f32 %v1741_v2  ;;  %v1582_v1 = vrot.slane %v1180_v20, 2  ;;  %v1182_v29 = vadd.f32 %v1155_v7, %v3851_v57 }
 0x292   : > { %v1657_v28 = vsub.f32 %v1649_v41, %v3437_v11  ;;  %v1650_v47 = vmul.f32 18.0, %v1602_v6  ;;  %v1651_v17 = vmul.f32 18.0, %v1603_v10  ;;  %v1548_v40 = vsel %vm1198_vm3, %v1546_v56, %v1547_v5 }
 0x293   : > { %v1760_v37 = vsub.f32 1.0, %v1752_v60  ;;  %v2007_v9 = vpop.eup %2006  ;;  %2010 = vrcp.f32 %v1742_v21  ;;  %v1568_v61 = vadd.f32 %v1548_v40, %v1180_v20  ;;  %v1584_v32 = vsel %vm1235_vm4, %v1582_v1, %v1583_v59 }
 0x294   : > { %v1665_v34 = vadd.f32 0.0729, %v1657_v28  ;;  %v1658_v2 = vsub.f32 %v1650_v47, %v3461_v43  ;;  %v1659_v11 = vsub.f32 %v1651_v17, %v3464_v26  ;;  %v1183_v62 = vadd.f32 %v1157_v8, %v3852_v15  ;;  %v1159_v26 = vpop.permute.xlu0 %1158 }
 0x295   : > { %v1768_v30 = vmul.f32 0.5, %v1760_v37  ;;  %v1604_v33 = vadd.f32 %v1584_v32, %v1568_v61  ;;  %v1549_v13 = vrot.slane %v1182_v29, 1  ;;  %v1585_v45 = vrot.slane %v1182_v29, 2 }
 0x296   : > { %v1673_v46 = vmul.f32 %v1665_v34, %v3456_v58  ;;  %v1666_v0 = vadd.f32 0.0729, %v1658_v2  ;;  %v1667_v21 = vadd.f32 0.0729, %v1659_v11  ;;  %v1185_v44 = vadd.f32 %v1161_v23, %v3853_v63 }
 0x297   : > { %v1776_v53 = vmax.f32 %v1768_v30, 0.0  ;;  %v1652_v20 = vmul.f32 18.0, %v1604_v33  ;;  %v1550_v27 = vsel %vm1198_vm3, %v1547_v5, %v1549_v13  ;;  %v1586_v43 = vsel %vm1235_vm4, %v1583_v59, %v1585_v45 }
 0x298   : > { %v1753_v49 = vmul.f32 %v2001_v55, %v1673_v46  ;;  %v1674_v18 = vmul.f32 %v1666_v0, %v3486_v14  ;;  %v1675_v58 = vmul.f32 %v1667_v21, %v3506_v48  ;;  %v1569_v8 = vadd.f32 %v1550_v27, %v1181_v52 }
 0x299   : > { %v1784_v22 = vmin.f32 %v1776_v53, 1.0  ;;  %2012 = vrcp.f32 %v3525_v19  ;;  %v1660_v16 = vsub.f32 %v1652_v20, %v3492_v36  ;;  %v1551_v50 = vrot.slane %v1183_v62, 1 }
 0x29a   : > { %v1761_v42 = vsub.f32 1.0, %v1753_v49  ;;  %v1754_v55 = vmul.f32 %v2003_v38, %v1674_v18  ;;  %v1755_v31 = vmul.f32 %v2005_v3, %v1675_v58  ;;  %v1605_v7 = vadd.f32 %v1586_v43, %v1569_v8 }
 0x29b   : > { %1793 = vst.msk [vmem:[%s3559_s28] sm:$0xff] %vm1792_vm5, %v1784_v22  ;;  %v1184_v41 = vadd.f32 %v1159_v26, %v3384_v24  ;;  %v1668_v35 = vadd.f32 0.0729, %v1660_v16  ;;  %v1587_v48 = vrot.slane %v1183_v62, 2  ;;  %v1554_v52 = vrot.slane %v1185_v44, 1 }
 0x29c   : > { %v1769_v14 = vmul.f32 0.5, %v1761_v42  ;;  %v1762_v5 = vsub.f32 1.0, %v1754_v55  ;;  %v1763_v19 = vsub.f32 1.0, %v1755_v31  ;;  %v1653_v59 = vmul.f32 18.0, %v1605_v7 }
 0x29d   : > { %v1552_v60 = vrot.slane %v1184_v41, 1  ;;  %v1676_v6 = vmul.f32 %v1668_v35, %v3510_v54  ;;  %v1590_v10 = vrot.slane %v1185_v44, 2  ;;  %v1588_v56 = vrot.slane %v1184_v41, 2 }
 0x29e   : > { %v1777_v36 = vmax.f32 %v1769_v14, 0.0  ;;  %v2009_v28 = vpop.eup %2008  ;;  %v1770_v38 = vmul.f32 0.5, %v1762_v5  ;;  %v1771_v3 = vmul.f32 0.5, %v1763_v19  ;;  %v1661_v1 = vsub.f32 %v1653_v59, %v3501_v4 }
 0x29f   : > { %v1553_v24 = vsel %vm1198_vm3, %v1551_v50, %v1552_v60  ;;  %v1756_v29 = vmul.f32 %v2007_v9, %v1676_v6  ;;  %v1555_v37 = vsel %vm1198_vm3, %v1552_v60, %v1554_v52  ;;  %v1615_v32 = vmul.f32 %v3494_v12, %v3399_v25 }
 0x2a0   : > { %v1785_v57 = vmin.f32 %v1777_v36, 1.0  ;;  %v1570_v47 = vadd.f32 %v1553_v24, %v1183_v62  ;;  %v2011_v17 = vpop.eup %2010  ;;  %v1778_v40 = vmax.f32 %v1770_v38, 0.0  ;;  %v1779_v34 = vmax.f32 %v1771_v3, 0.0 }
 0x2a1   : > { %v1669_v54 = vadd.f32 0.0729, %v1661_v1  ;;  %v1571_v61 = vadd.f32 %v1555_v37, %v1184_v41  ;;  %v1764_v4 = vsub.f32 1.0, %v1756_v29  ;;  %v1589_v23 = vsel %vm1235_vm4, %v1587_v48, %v1588_v56 }
 0x2a2   : > { %1794 = vst.msk [vmem:[%s3559_s28 + $0x8] sm:$0xff] %vm1792_vm5, %v1785_v57  ;;  %v1591_v9 = vsel %vm1235_vm4, %v1588_v56, %v1590_v10  ;;  %v1786_v30 = vmin.f32 %v1778_v40, 1.0  ;;  %v1787_v2 = vmin.f32 %v1779_v34, 1.0  ;;  %v1606_v15 = vadd.f32 %v1589_v23, %v1570_v47 }
 0x2a3   : > { %v1677_v11 = vmul.f32 %v1669_v54, %v3521_v39  ;;  %v1772_v62 = vmul.f32 0.5, %v1764_v4  ;;  %v1607_v46 = vadd.f32 %v1591_v9, %v1571_v61  ;;  %v1638_v33 = vmul.f32 2.0, %v3536_v51 }
 0x2a4   : > { %1795 = vst.msk [vmem:[%s3559_s28 + $0x10] sm:$0xff] %vm1792_vm5, %v1786_v30  ;;  %1796 = vst.msk [vmem:[%s3559_s28 + $0x18] sm:$0xff] %vm1792_vm5, %v1787_v2  ;;  %v1654_v12 = vmul.f32 18.0, %v1606_v15  ;;  %v1639_v13 = vmul.f32 2.0, %v1615_v32 }
 0x2a5   : > { %v1757_v25 = vmul.f32 %v2009_v28, %v1677_v11  ;;  %v1780_v45 = vmax.f32 %v1772_v62, 0.0  ;;  %v1655_v53 = vmul.f32 18.0, %v1607_v46  ;;  %v1646_v49 = vadd.f32 0.0081, %v1638_v33 }
 0x2a6   : > { %v2013_v0 = vpop.eup %2012  ;;  %v1662_v63 = vsub.f32 %v1654_v12, %v1638_v33  ;;  %v1647_v27 = vadd.f32 0.0081, %v1639_v13 }
 0x2a7   : > { %v1765_v21 = vsub.f32 1.0, %v1757_v25  ;;  %v1788_v39 = vmin.f32 %v1780_v45, 1.0  ;;  %v1663_v44 = vsub.f32 %v1655_v53, %v1639_v13 }
 0x2a8   : > { %v1670_v51 = vadd.f32 0.0729, %v1662_v63 }
 0x2a9   : > { %v1773_v20 = vmul.f32 0.5, %v1765_v21  ;;  %1797 = vst.msk [vmem:[%s3559_s28 + $0x20] sm:$0xff] %vm1792_vm5, %v1788_v39  ;;  %v1671_v43 = vadd.f32 0.0729, %v1663_v44 }
 0x2aa   : > { %v1678_v22 = vmul.f32 %v1670_v51, %v1646_v49 }
 0x2ab   : > { %v1781_v26 = vmax.f32 %v1773_v20, 0.0  ;;  %v1679_v18 = vmul.f32 %v1671_v43, %v1647_v27 }
 0x2ac   : > { %v1758_v8 = vmul.f32 %v2011_v17, %v1678_v22 }
 0x2ad   : > { %v1789_v58 = vmin.f32 %v1781_v26, 1.0  ;;  %v1759_v42 = vmul.f32 %v2013_v0, %v1679_v18 }
 0x2ae   : > { %v1766_v16 = vsub.f32 1.0, %v1758_v8 }
 0x2af   : > { %1798 = vst.msk [vmem:[%s3559_s28 + $0x28] sm:$0xff] %vm1792_vm5, %v1789_v58  ;;  %v1767_v50 = vsub.f32 1.0, %v1759_v42 }
 0x2b0   : > { %v1774_v55 = vmul.f32 0.5, %v1766_v16 }
 0x2b1   : > { %v1775_v31 = vmul.f32 0.5, %v1767_v50 }
 0x2b2   : > { %v1782_v7 = vmax.f32 %v1774_v55, 0.0 }
 0x2b3   : > { %v1783_v41 = vmax.f32 %v1775_v31, 0.0 }
 0x2b4   : > { %v1790_v14 = vmin.f32 %v1782_v7, 1.0 }
 0x2b5   : > { %v1791_v35 = vmin.f32 %v1783_v41, 1.0 }
 0x2b6   : > { %1799 = vst.msk [vmem:[%s3559_s28 + $0x30] sm:$0xff] %vm1792_vm5, %v1790_v14 }
 0x2b7   : > { %1800 = vst.msk [vmem:[%s3559_s28 + $0x38] sm:$0xff] %vm1792_vm5, %v1791_v35 }
 0x2b8   : > { %2083 = shalt.err (!%p2080_p4)
}
 0x2b9   : > { %s2084_s4 = scalar_lea.hbm %s3589_s23, 1024  ;;  %s2088_s5 = scalar_lea.hbm %s3640_s2, 2048 }
 0x2ba   : > { %p2085_p9 = scmp.ne.s32.totalorder %s3589_s23, %s2084_s4  ;;  %p2089_p5 = scmp.lt.s32.totalorder %s3589_s23, %s3640_s2 }
 0x2bb   : > { %p2090_p8 = scmp.lt.s32.totalorder %s2088_s5, %s2084_s4 }
 0x2bc   : > { %p2086_p11 = pnand %p2085_p9, %p3854_p1 }
 0x2bd   : > { %p2091_p6 = por %p2090_p8, %p2089_p5 }
 0x2be   : > { %p2087_p3 = pneg %p2086_p11 }
 0x2c0   : > { %p2092_p13 = pnand %p2091_p6, %p2087_p3 }
 0x2c2   : > { %2095 = shalt.err (!%p2092_p13)
}
 0x2c3   : > { %s2149_s14 = smov 128   ;;  %s2150_s17 = smov 8  }
 0x2c4   : > { %1943 = dma.vmem_to_hbm [thread:$0]  (%p3854_p1), %s3591_s24, 1024, %s3589_s23, %s1802_s13, %s2149_s14, %s2149_s14, %s2150_s17  }
 0x2c5 PF: > { %s1831_s28 = sand.u32 1, %s2126_s9   ;;  %p3855_p12 = scmp.ne.s32.totalorder %s3676_s22, 0 }
 0x2c6   : > { %p3856_p7 = scmp.ge.s32.totalorder %s2138_s12, 2  ;;  %s1832_s19 = scalar_lea.sflag [#allocation4], %s1831_s28 }
 0x2c8   : > { %p1953_p10 = pnand %p3856_p7, %p3855_p12 }
 0x2ca   : > { %p1954_p0 = pneg %p1953_p10 }
 0x2cc   : > { %2121 = dma.done.wait (%p1954_p0), %s1832_s19, 1024  }
 0x2cd   : > { %2123 = vsyncadd (%p1954_p0), %s1832_s19, 4294966272  ;;  %p18_p2 = scmp.ge.s32.totalorder %s2191_s15, 4   ;;  %s3857_s9 = smov %s2130_s10 }
 0x2ce   : > { %s3858_s10 = smov %s2134_s11  ;;  %s3859_s11 = smov %s2203_s18 }
 0x2cf   : > { %s3860_s12 = smov %s2191_s15  ;;  %20 = sbr.rel (!%p18_p2) target bundleno = 7 (0x7), region = 86 }
 0x2d4   :  { %1837 = vsyncpa [#allocation3], 1 }
 0x2d5   :  { %1839 = vsyncpa [#allocation3 + $0x1], 1 }
 0x2d6   :  { %1840 = vsyncpa [#allocation6], 1 }
 0x2d7   :  { %1842 = vsyncpa [#allocation6 + $0x1], 1 }
 0x2d8   :  { %1843 = vsyncpa [#allocation4], 1 }
 0x2d9   :  { %1845 = vsyncpa [#allocation4 + $0x1], 1 }

</bundles_post_ra>
